<compile_context>
chip_gen: v7x
topology: tpu7x:2x2x1
jax: 0.10.0
libtpu: 0.0.40
codegen_flags: <defaults>
</compile_context>

<pallas_src>
import jax
import jax.numpy as jnp
import numpy as np
from jax import lax
from jax.experimental import pallas as pl
from jax.experimental.pallas import tpu as pltpu

EXPANSION = 4


def _bottleneck_kernel(x_ref, w1_ref, b1_ref, w2_ref, b2_ref, w3_ref, b3_ref,
                       out_ref, acc_ref):
    B_blk, H, W, Cin = x_ref.shape
    P = w1_ref.shape[1]
    HW = H * W
    fuse_ky = (len(w2_ref.shape) == 2)   # (3P, 3P) fused RHS vs (3, 3P, P)

    # Column index of each flattened row; shared by every image in the block.
    col = lax.broadcasted_iota(jnp.int32, (HW, 1), 0) % W

    for b in range(B_blk):  # static unroll -> per-image halo math stays exact
        # --- conv1 (1x1, no bias) + bn1 (scale folded into w1) + relu -------
        x_bf = x_ref[b].reshape(HW, Cin)                          # bf16
        h1 = jnp.dot(x_bf, w1_ref[...], preferred_element_type=jnp.float32)
        h1 = jnp.maximum(h1 + b1_ref[...], 0.0)                   # (HW, P) f32

        # --- conv2 (3x3, stride 1, pad 1) + bn2 + relu ----------------------
        # kx taps folded into the contraction dim (K = 3P) via sublane rolls
        # (non-negative shifts only) + boundary masks.
        left = jnp.where(col >= 1, pltpu.roll(h1, shift=1, axis=0),
                         0.0).astype(jnp.bfloat16)                # h1[y, x-1]
        right = jnp.where(col <= W - 2, pltpu.roll(h1, shift=HW - 1, axis=0),
                          0.0).astype(jnp.bfloat16)               # h1[y, x+1]
        h1_cat = jnp.concatenate([left, h1.astype(jnp.bfloat16), right],
                                 axis=-1)                         # (HW, 3P) bf16

        if fuse_ky:
            # Single (HW,3P)x(3P,3P) matmul; lane slices are free (P%128==0).
            m = jnp.dot(h1_cat, w2_ref[...], preferred_element_type=jnp.float32)
            m0, m1, m2 = m[:, :P], m[:, P:2 * P], m[:, 2 * P:]
        else:
            m0 = jnp.dot(h1_cat, w2_ref[0], preferred_element_type=jnp.float32)
            m1 = jnp.dot(h1_cat, w2_ref[1], preferred_element_type=jnp.float32)
            m2 = jnp.dot(h1_cat, w2_ref[2], preferred_element_type=jnp.float32)

        # ky taps accumulated with row-offset slice-adds (no concat slabs).
        acc_ref[...] = m1
        acc_ref[pl.ds(W, HW - W), :] += m0[:HW - W]   # ky=0: out[y] += m0[y-1]
        acc_ref[pl.ds(0, HW - W), :] += m2[W:]        # ky=2: out[y] += m2[y+1]
        h2 = jnp.maximum(acc_ref[...] + b2_ref[...], 0.0).astype(jnp.bfloat16)

        # --- conv3 (1x1, no bias) + bn3 -------------------------------------
        h3 = jnp.dot(h2, w3_ref[...], preferred_element_type=jnp.float32)
        h3 = h3 + b3_ref[...]                                     # (HW, 4P) f32

        # --- residual add (identity, downsample=None) + relu ----------------
        res = x_ref[b].reshape(HW, Cin).astype(jnp.float32)
        out = jnp.maximum(h3 + res, 0.0)
        out_ref[b] = out.reshape(H, W, Cin).astype(out_ref.dtype)


def bottleneck_pallas(x_nhwc, w1, w2, w3, bn1, bn2, bn3, eps=1e-5,
                      batch_block=1):
    """x_nhwc: (N,H,W,Cin); w1:(Cin,P); w2:(3,3,P,P) [kh,kw,in,out]; w3:(P,4P).

    Returns a bf16 NHWC tensor (activations travel through HBM in bf16).
    """
    N, H, W, Cin = x_nhwc.shape
    P = w1.shape[1]
    Cout = w3.shape[1]
    assert Cout == Cin, "downsample=None requires in_planes == planes*expansion"
    assert N % batch_block == 0, "batch_block must divide N"
    B_blk = batch_block

    def fold(bn):
        gamma, beta, mean, var = bn
        scale = (gamma / jnp.sqrt(var + eps)).astype(jnp.float32)
        shift = (beta - mean * scale).astype(jnp.float32)
        return scale, shift

    s1, b1 = fold(bn1)
    s2, b2 = fold(bn2)
    s3, b3 = fold(bn3)

    # Fold BN scale into conv weights (f32 multiply, then bf16 cast for MXU).
    w1_bf = (w1 * s1[None, :]).astype(jnp.bfloat16)                 # (Cin, P)
    w2_s = (w2.astype(jnp.float32) * s2[None, None, None, :])       # (3,3,P,P)
    w2_r = w2_s.reshape(3, 3 * P, P)                                # (ky, kx*P+ci, co)
    fuse_ky = (P % 128 == 0)
    if fuse_ky:
        # One (3P, 3P) RHS: one MXU weight push / drain, lane slices free.
        w2_bf = jnp.concatenate([w2_r[0], w2_r[1], w2_r[2]],
                                axis=-1).astype(jnp.bfloat16)       # (3P, 3P)
    else:
        w2_bf = w2_r.astype(jnp.bfloat16)                           # (3, 3P, P)
    w3_bf = (w3 * s3[None, :]).astype(jnp.bfloat16)                 # (P, 4P)

    b1 = b1.reshape(1, -1)
    b2 = b2.reshape(1, -1)
    b3 = b3.reshape(1, -1)

    # bf16 activations into / out of the kernel (memory-bound stages).
    x_bf = x_nhwc.astype(jnp.bfloat16)

    def full_spec(a):
        nd = a.ndim
        return pl.BlockSpec(a.shape, lambda n, nd=nd: (0,) * nd)

    # Conservative scoped-VMEM limit: safe under v7x's 64 MiB per-core VMEM,
    # ample for the bf16 blocks + f32 intermediates on all generations.
    vmem_limit = 40 << 20

    return pl.pallas_call(
        _bottleneck_kernel,
        out_shape=jax.ShapeDtypeStruct((N, H, W, Cout), jnp.bfloat16),
        grid_spec=pltpu.PrefetchScalarGridSpec(
            num_scalar_prefetch=0,
            grid=(N // B_blk,),
            in_specs=[
                pl.BlockSpec((B_blk, H, W, Cin), lambda n: (n, 0, 0, 0)),
                full_spec(w1_bf), full_spec(b1),
                full_spec(w2_bf), full_spec(b2),
                full_spec(w3_bf), full_spec(b3),
            ],
            out_specs=pl.BlockSpec((B_blk, H, W, Cout), lambda n: (n, 0, 0, 0)),
            scratch_shapes=[pltpu.VMEM((H * W, P), jnp.float32)],
        ),
        compiler_params=pltpu.CompilerParams(
            dimension_semantics=("parallel",),
            vmem_limit_bytes=vmem_limit),
    )(x_bf, w1_bf, b1, w2_bf, b2, w3_bf, b3)


def bottleneck_ref(x_nhwc, w1, w2, w3, bn1, bn2, bn3, eps=1e-5):
    """Pure-JAX f32 reference (inference-mode BN) for correctness checking."""
    def bn(y, p):
        gamma, beta, mean, var = p
        return (y - mean) * (gamma / jnp.sqrt(var + eps)) + beta
    dn = ('NHWC', 'HWIO', 'NHWC')
    h = lax.conv_general_dilated(x_nhwc, w1[None, None], (1, 1), 'VALID',
                                 dimension_numbers=dn)
    h = jax.nn.relu(bn(h, bn1))
    h = lax.conv_general_dilated(h, w2, (1, 1), ((1, 1), (1, 1)),
                                 dimension_numbers=dn)
    h = jax.nn.relu(bn(h, bn2))
    h = lax.conv_general_dilated(h, w3[None, None], (1, 1), 'VALID',
                                 dimension_numbers=dn)
    h = bn(h, bn3)
    return jax.nn.relu(h + x_nhwc)


if __name__ == "__main__":
    key = jax.random.PRNGKey(0)
    N, H, W = 2, 16, 16
    planes = 4
    in_planes = planes * EXPANSION   # 16 -> identity add valid (downsample=None)

    ks = jax.random.split(key, 8)
    # PyTorch conv weights are (out, in, kh, kw); generated directly in the
    # layouts the kernel consumes: (in, out) for 1x1, (kh, kw, in, out) for 3x3.
    x_nchw = jax.random.normal(ks[0], (N, in_planes, H, W), jnp.float32)
    w1 = 0.1 * jax.random.normal(ks[1], (in_planes, planes), jnp.float32)
    w2 = 0.1 * jax.random.normal(ks[2], (3, 3, planes, planes), jnp.float32)
    w3 = 0.1 * jax.random.normal(ks[3], (planes, planes * EXPANSION), jnp.float32)

    def mk_bn(k, c):
        k1, k2, k3, k4 = jax.random.split(k, 4)
        gamma = 1.0 + 0.1 * jax.random.normal(k1, (c,), jnp.float32)
        beta = 0.1 * jax.random.normal(k2, (c,), jnp.float32)
        mean = 0.1 * jax.random.normal(k3, (c,), jnp.float32)
        var = jnp.abs(jax.random.normal(k4, (c,), jnp.float32)) + 0.5
        return (gamma, beta, mean, var)

    bn1 = mk_bn(ks[4], planes)
    bn2 = mk_bn(ks[5], planes)
    bn3 = mk_bn(ks[6], planes * EXPANSION)

    # TODO(synk): training-mode BatchNorm (batch statistics) is not implemented;
    # inference-mode (running stats) semantics are used, folded into the conv
    # weights (scale) and a per-channel shift.
    x_nhwc = jnp.transpose(x_nchw, (0, 2, 3, 1))      # NCHW -> NHWC
    ref = bottleneck_ref(x_nhwc, w1, w2, w3, bn1, bn2, bn3)

    # bf16 activations + bf16 MXU operands loosen tolerance vs. f32 reference.
    for bb in (1, 2):   # exercise both per-image and batch-blocked grids
        out = jax.block_until_ready(
            bottleneck_pallas(x_nhwc, w1, w2, w3, bn1, bn2, bn3,
                              batch_block=bb))
        np.testing.assert_allclose(np.asarray(out.astype(jnp.float32)),
                                   np.asarray(ref),
                                   rtol=5e-2, atol=5e-2)
    print("KERNEL_OK")
</pallas_src>

<mosaic_0001>
module attributes {stable_mosaic.version = 11 : i64} {
  func.func @_bottleneck_kernel(%arg0: i32, %arg1: memref<1x16x16x16xbf16, #tpu.memory_space<vmem>>, %arg2: memref<16x4xbf16, #tpu.memory_space<vmem>>, %arg3: memref<1x4xf32, #tpu.memory_space<vmem>>, %arg4: memref<3x12x4xbf16, #tpu.memory_space<vmem>>, %arg5: memref<1x4xf32, #tpu.memory_space<vmem>>, %arg6: memref<4x16xbf16, #tpu.memory_space<vmem>>, %arg7: memref<1x16xf32, #tpu.memory_space<vmem>>, %arg8: memref<1x16x16x16xbf16, #tpu.memory_space<vmem>>, %arg9: memref<256x4xf32, #tpu.memory_space<vmem>>) attributes {dimension_semantics = [#tpu.dimension_semantics<parallel>], iteration_bounds = array<i64: 2>, scalar_prefetch = 0 : i64, scratch_operands = 1 : i64, tpu.core_type = #tpu.core_type<tc>, window_params = [{transform_indices = @transform_0, window_bounds = array<i64: 1, 16, 16, 16>}, {pipeline_mode = #tpu.pipeline_mode<synchronous>, transform_indices = @transform_1, window_bounds = array<i64: 16, 4>}, {pipeline_mode = #tpu.pipeline_mode<synchronous>, transform_indices = @transform_2, window_bounds = array<i64: 1, 4>}, {pipeline_mode = #tpu.pipeline_mode<synchronous>, transform_indices = @transform_3, window_bounds = array<i64: 3, 12, 4>}, {pipeline_mode = #tpu.pipeline_mode<synchronous>, transform_indices = @transform_4, window_bounds = array<i64: 1, 4>}, {pipeline_mode = #tpu.pipeline_mode<synchronous>, transform_indices = @transform_5, window_bounds = array<i64: 4, 16>}, {pipeline_mode = #tpu.pipeline_mode<synchronous>, transform_indices = @transform_6, window_bounds = array<i64: 1, 16>}, {transform_indices = @transform_7, window_bounds = array<i64: 1, 16, 16, 16>}]} {
    %0 = tpu.iota {dimensions = array<i32: 0>} : vector<256x1xi32>
    %c16_i32 = arith.constant 16 : i32
    %c0_i32 = arith.constant 0 : i32
    %1 = arith.cmpi eq, %c16_i32, %c0_i32 : i32
    %c1_i32 = arith.constant 1 : i32
    %2 = arith.select %1, %c1_i32, %c16_i32 : i32
    %3 = vector.broadcast %2 : i32 to vector<256x1xi32>
    %4 = arith.remsi %0, %3 : vector<256x1xi32>
    %c0_i32_0 = arith.constant 0 : i32
    %5 = vector.broadcast %c0_i32_0 : i32 to vector<256x1xi32>
    %6 = arith.cmpi ne, %4, %5 : vector<256x1xi32>
    %c0_i32_1 = arith.constant 0 : i32
    %7 = vector.broadcast %c0_i32_1 : i32 to vector<256x1xi32>
    %8 = arith.cmpi slt, %4, %7 : vector<256x1xi32>
    %c0_i32_2 = arith.constant 0 : i32
    %9 = arith.cmpi slt, %2, %c0_i32_2 : i32
    %10 = vector.broadcast %9 : i1 to vector<256x1xi1>
    %11 = vector.broadcast %10 : vector<256x1xi1> to vector<256x1xi1>
    %12 = arith.xori %8, %11 : vector<256x1xi1>
    %13 = arith.andi %12, %6 : vector<256x1xi1>
    %14 = vector.broadcast %2 : i32 to vector<256x1xi32>
    %15 = arith.addi %4, %14 : vector<256x1xi32>
    %16 = arith.select %13, %15, %4 : vector<256x1xi1>, vector<256x1xi32>
    %c0 = arith.constant 0 : index
    %c0_3 = arith.constant 0 : index
    %c0_4 = arith.constant 0 : index
    %c0_5 = arith.constant 0 : index
    %17 = vector.load %arg1[%c0, %c0_3, %c0_4, %c0_5] : memref<1x16x16x16xbf16, #tpu.memory_space<vmem>>, vector<1x16x16x16xbf16>
    %18 = vector.shape_cast %17 : vector<1x16x16x16xbf16> to vector<16x16x16xbf16>
    %19 = vector.shape_cast %18 : vector<16x16x16xbf16> to vector<256x16xbf16>
    %c0_6 = arith.constant 0 : index
    %c0_7 = arith.constant 0 : index
    %20 = vector.load %arg2[%c0_6, %c0_7] : memref<16x4xbf16, #tpu.memory_space<vmem>>, vector<16x4xbf16>
    %cst = arith.constant dense<0.000000e+00> : vector<256x4xf32>
    %21 = tpu.matmul %19, %20, %cst {dimension_numbers = #tpu.dot_dimension_numbers<[1], [0], [0], [1], [0, 0, 1, 1], [], []>} : vector<256x16xbf16>, vector<16x4xbf16>, vector<256x4xf32> -> vector<256x4xf32>
    %c0_8 = arith.constant 0 : index
    %c0_9 = arith.constant 0 : index
    %22 = vector.load %arg3[%c0_8, %c0_9] : memref<1x4xf32, #tpu.memory_space<vmem>>, vector<1x4xf32>
    %23 = vector.broadcast %22 : vector<1x4xf32> to vector<256x4xf32>
    %24 = arith.addf %21, %23 : vector<256x4xf32>
    %cst_10 = arith.constant 0.000000e+00 : f32
    %25 = vector.broadcast %cst_10 : f32 to vector<256x4xf32>
    %26 = arith.maximumf %24, %25 : vector<256x4xf32>
    %c1_i32_11 = arith.constant 1 : i32
    %27 = vector.broadcast %c1_i32_11 : i32 to vector<256x1xi32>
    %28 = arith.cmpi sge, %16, %27 : vector<256x1xi32>
    %c1_i32_12 = arith.constant 1 : i32
    %29 = tpu.dynamic_rotate %26 by %c1_i32_12 dim 0 : vector<256x4xf32>, i32 -> vector<256x4xf32>
    %cst_13 = arith.constant 0.000000e+00 : f32
    %30 = vector.shape_cast %28 : vector<256x1xi1> to vector<256x1xi1>
    %31 = vector.broadcast %30 : vector<256x1xi1> to vector<256x4xi1>
    %32 = vector.broadcast %cst_13 : f32 to vector<256x4xf32>
    %33 = arith.select %31, %29, %32 : vector<256x4xi1>, vector<256x4xf32>
    %34 = arith.truncf %33 : vector<256x4xf32> to vector<256x4xbf16>
    %c14_i32 = arith.constant 14 : i32
    %35 = vector.broadcast %c14_i32 : i32 to vector<256x1xi32>
    %36 = arith.cmpi sle, %16, %35 : vector<256x1xi32>
    %c255_i32 = arith.constant 255 : i32
    %37 = tpu.dynamic_rotate %26 by %c255_i32 dim 0 : vector<256x4xf32>, i32 -> vector<256x4xf32>
    %cst_14 = arith.constant 0.000000e+00 : f32
    %38 = vector.shape_cast %36 : vector<256x1xi1> to vector<256x1xi1>
    %39 = vector.broadcast %38 : vector<256x1xi1> to vector<256x4xi1>
    %40 = vector.broadcast %cst_14 : f32 to vector<256x4xf32>
    %41 = arith.select %39, %37, %40 : vector<256x4xi1>, vector<256x4xf32>
    %42 = arith.truncf %41 : vector<256x4xf32> to vector<256x4xbf16>
    %43 = arith.truncf %26 : vector<256x4xf32> to vector<256x4xbf16>
    %44 = tpu.concatenate %34, %43, %42 in 1 : vector<256x4xbf16>, vector<256x4xbf16>, vector<256x4xbf16> -> vector<256x12xbf16>
    %c0_15 = arith.constant 0 : index
    %c0_16 = arith.constant 0 : index
    %c0_17 = arith.constant 0 : index
    %45 = vector.load %arg4[%c0_15, %c0_16, %c0_17] : memref<3x12x4xbf16, #tpu.memory_space<vmem>>, vector<1x12x4xbf16>
    %46 = vector.shape_cast %45 : vector<1x12x4xbf16> to vector<12x4xbf16>
    %cst_18 = arith.constant dense<0.000000e+00> : vector<256x4xf32>
    %47 = tpu.matmul %44, %46, %cst_18 {dimension_numbers = #tpu.dot_dimension_numbers<[1], [0], [0], [1], [0, 0, 1, 1], [], []>} : vector<256x12xbf16>, vector<12x4xbf16>, vector<256x4xf32> -> vector<256x4xf32>
    %c1 = arith.constant 1 : index
    %c0_19 = arith.constant 0 : index
    %c0_20 = arith.constant 0 : index
    %48 = vector.load %arg4[%c1, %c0_19, %c0_20] : memref<3x12x4xbf16, #tpu.memory_space<vmem>>, vector<1x12x4xbf16>
    %49 = vector.shape_cast %48 : vector<1x12x4xbf16> to vector<12x4xbf16>
    %cst_21 = arith.constant dense<0.000000e+00> : vector<256x4xf32>
    %50 = tpu.matmul %44, %49, %cst_21 {dimension_numbers = #tpu.dot_dimension_numbers<[1], [0], [0], [1], [0, 0, 1, 1], [], []>} : vector<256x12xbf16>, vector<12x4xbf16>, vector<256x4xf32> -> vector<256x4xf32>
    %c2 = arith.constant 2 : index
    %c0_22 = arith.constant 0 : index
    %c0_23 = arith.constant 0 : index
    %51 = vector.load %arg4[%c2, %c0_22, %c0_23] : memref<3x12x4xbf16, #tpu.memory_space<vmem>>, vector<1x12x4xbf16>
    %52 = vector.shape_cast %51 : vector<1x12x4xbf16> to vector<12x4xbf16>
    %cst_24 = arith.constant dense<0.000000e+00> : vector<256x4xf32>
    %53 = tpu.matmul %44, %52, %cst_24 {dimension_numbers = #tpu.dot_dimension_numbers<[1], [0], [0], [1], [0, 0, 1, 1], [], []>} : vector<256x12xbf16>, vector<12x4xbf16>, vector<256x4xf32> -> vector<256x4xf32>
    %c0_25 = arith.constant 0 : index
    %c0_26 = arith.constant 0 : index
    %54 = vector.load %arg9[%c0_25, %c0_26] : memref<256x4xf32, #tpu.memory_space<vmem>>, vector<256x4xf32>
    tpu.vector_store %arg9[%c0_25, %c0_26], %50 {strides = array<i32>} : memref<256x4xf32, #tpu.memory_space<vmem>>, vector<256x4xf32>,
    %c16 = arith.constant 16 : index
    %c0_27 = arith.constant 0 : index
    %55 = vector.load %arg9[%c16, %c0_27] : memref<256x4xf32, #tpu.memory_space<vmem>>, vector<240x4xf32>
    %56 = vector.extract_strided_slice %47 {offsets = [0, 0], sizes = [240, 4], strides = [1, 1]} : vector<256x4xf32> to vector<240x4xf32>
    %57 = arith.addf %55, %56 : vector<240x4xf32>
    %c16_28 = arith.constant 16 : index
    %c0_29 = arith.constant 0 : index
    %58 = vector.load %arg9[%c16_28, %c0_29] : memref<256x4xf32, #tpu.memory_space<vmem>>, vector<240x4xf32>
    tpu.vector_store %arg9[%c16_28, %c0_29], %57 {strides = array<i32>} : memref<256x4xf32, #tpu.memory_space<vmem>>, vector<240x4xf32>,
    %c0_30 = arith.constant 0 : index
    %c0_31 = arith.constant 0 : index
    %59 = vector.load %arg9[%c0_30, %c0_31] : memref<256x4xf32, #tpu.memory_space<vmem>>, vector<240x4xf32>
    %60 = vector.extract_strided_slice %53 {offsets = [16, 0], sizes = [240, 4], strides = [1, 1]} : vector<256x4xf32> to vector<240x4xf32>
    %61 = arith.addf %59, %60 : vector<240x4xf32>
    %c0_32 = arith.constant 0 : index
    %c0_33 = arith.constant 0 : index
    %62 = vector.load %arg9[%c0_32, %c0_33] : memref<256x4xf32, #tpu.memory_space<vmem>>, vector<240x4xf32>
    tpu.vector_store %arg9[%c0_32, %c0_33], %61 {strides = array<i32>} : memref<256x4xf32, #tpu.memory_space<vmem>>, vector<240x4xf32>,
    %c0_34 = arith.constant 0 : index
    %c0_35 = arith.constant 0 : index
    %63 = vector.load %arg9[%c0_34, %c0_35] : memref<256x4xf32, #tpu.memory_space<vmem>>, vector<256x4xf32>
    %c0_36 = arith.constant 0 : index
    %c0_37 = arith.constant 0 : index
    %64 = vector.load %arg5[%c0_36, %c0_37] : memref<1x4xf32, #tpu.memory_space<vmem>>, vector<1x4xf32>
    %65 = vector.broadcast %64 : vector<1x4xf32> to vector<256x4xf32>
    %66 = arith.addf %63, %65 : vector<256x4xf32>
    %cst_38 = arith.constant 0.000000e+00 : f32
    %67 = vector.broadcast %cst_38 : f32 to vector<256x4xf32>
    %68 = arith.maximumf %66, %67 : vector<256x4xf32>
    %69 = arith.truncf %68 : vector<256x4xf32> to vector<256x4xbf16>
    %c0_39 = arith.constant 0 : index
    %c0_40 = arith.constant 0 : index
    %70 = vector.load %arg6[%c0_39, %c0_40] : memref<4x16xbf16, #tpu.memory_space<vmem>>, vector<4x16xbf16>
    %cst_41 = arith.constant dense<0.000000e+00> : vector<256x16xf32>
    %71 = tpu.matmul %69, %70, %cst_41 {dimension_numbers = #tpu.dot_dimension_numbers<[1], [0], [0], [1], [0, 0, 1, 1], [], []>} : vector<256x4xbf16>, vector<4x16xbf16>, vector<256x16xf32> -> vector<256x16xf32>
    %c0_42 = arith.constant 0 : index
    %c0_43 = arith.constant 0 : index
    %72 = vector.load %arg7[%c0_42, %c0_43] : memref<1x16xf32, #tpu.memory_space<vmem>>, vector<1x16xf32>
    %73 = vector.broadcast %72 : vector<1x16xf32> to vector<256x16xf32>
    %74 = arith.addf %71, %73 : vector<256x16xf32>
    %c0_44 = arith.constant 0 : index
    %c0_45 = arith.constant 0 : index
    %c0_46 = arith.constant 0 : index
    %c0_47 = arith.constant 0 : index
    %75 = vector.load %arg1[%c0_44, %c0_45, %c0_46, %c0_47] : memref<1x16x16x16xbf16, #tpu.memory_space<vmem>>, vector<1x16x16x16xbf16>
    %76 = vector.shape_cast %75 : vector<1x16x16x16xbf16> to vector<16x16x16xbf16>
    %77 = vector.shape_cast %76 : vector<16x16x16xbf16> to vector<256x16xbf16>
    %78 = arith.extf %77 : vector<256x16xbf16> to vector<256x16xf32>
    %79 = arith.addf %74, %78 : vector<256x16xf32>
    %cst_48 = arith.constant 0.000000e+00 : f32
    %80 = vector.broadcast %cst_48 : f32 to vector<256x16xf32>
    %81 = arith.maximumf %79, %80 : vector<256x16xf32>
    %82 = vector.shape_cast %81 : vector<256x16xf32> to vector<16x16x16xf32>
    %83 = arith.truncf %82 : vector<16x16x16xf32> to vector<16x16x16xbf16>
    %c0_49 = arith.constant 0 : index
    %c0_50 = arith.constant 0 : index
    %c0_51 = arith.constant 0 : index
    %c0_52 = arith.constant 0 : index
    %84 = vector.load %arg8[%c0_49, %c0_50, %c0_51, %c0_52] : memref<1x16x16x16xbf16, #tpu.memory_space<vmem>>, vector<1x16x16x16xbf16>
    %85 = vector.shape_cast %84 : vector<1x16x16x16xbf16> to vector<16x16x16xbf16>
    %86 = vector.shape_cast %83 : vector<16x16x16xbf16> to vector<1x16x16x16xbf16>
    tpu.vector_store %arg8[%c0_49, %c0_50, %c0_51, %c0_52], %86 {strides = array<i32>} : memref<1x16x16x16xbf16, #tpu.memory_space<vmem>>, vector<1x16x16x16xbf16>,
    return
  }
  func.func @transform_0(%arg0: i32) -> (i32, i32, i32, i32) {
    %c0_i32 = arith.constant 0 : i32
    %c0_i32_0 = arith.constant 0 : i32
    %c0_i32_1 = arith.constant 0 : i32
    %c0_i32_2 = arith.constant 0 : i32
    return %arg0, %c0_i32, %c0_i32_0, %c0_i32_1 : i32, i32, i32, i32
  }
  func.func @transform_1(%arg0: i32) -> (i32, i32) {
    %c0_i32 = arith.constant 0 : i32
    %c0_i32_0 = arith.constant 0 : i32
    %c0_i32_1 = arith.constant 0 : i32
    return %c0_i32, %c0_i32_0 : i32, i32
  }
  func.func @transform_2(%arg0: i32) -> (i32, i32) {
    %c0_i32 = arith.constant 0 : i32
    %c0_i32_0 = arith.constant 0 : i32
    %c0_i32_1 = arith.constant 0 : i32
    return %c0_i32, %c0_i32_0 : i32, i32
  }
  func.func @transform_3(%arg0: i32) -> (i32, i32, i32) {
    %c0_i32 = arith.constant 0 : i32
    %c0_i32_0 = arith.constant 0 : i32
    %c0_i32_1 = arith.constant 0 : i32
    %c0_i32_2 = arith.constant 0 : i32
    return %c0_i32, %c0_i32_0, %c0_i32_1 : i32, i32, i32
  }
  func.func @transform_4(%arg0: i32) -> (i32, i32) {
    %c0_i32 = arith.constant 0 : i32
    %c0_i32_0 = arith.constant 0 : i32
    %c0_i32_1 = arith.constant 0 : i32
    return %c0_i32, %c0_i32_0 : i32, i32
  }
  func.func @transform_5(%arg0: i32) -> (i32, i32) {
    %c0_i32 = arith.constant 0 : i32
    %c0_i32_0 = arith.constant 0 : i32
    %c0_i32_1 = arith.constant 0 : i32
    return %c0_i32, %c0_i32_0 : i32, i32
  }
  func.func @transform_6(%arg0: i32) -> (i32, i32) {
    %c0_i32 = arith.constant 0 : i32
    %c0_i32_0 = arith.constant 0 : i32
    %c0_i32_1 = arith.constant 0 : i32
    return %c0_i32, %c0_i32_0 : i32, i32
  }
  func.func @transform_7(%arg0: i32) -> (i32, i32, i32, i32) {
    %c0_i32 = arith.constant 0 : i32
    %c0_i32_0 = arith.constant 0 : i32
    %c0_i32_1 = arith.constant 0 : i32
    %c0_i32_2 = arith.constant 0 : i32
    return %arg0, %c0_i32, %c0_i32_0, %c0_i32_1 : i32, i32, i32, i32
  }
}

</mosaic_0001>

<bundles_post_ra>
// kernel: tpu_custom_call.1
= control target key start
LH: loop header
LB: loop body
LE: loop exit
PB: predicated region body
PF: predicated region fallthrough
CT: control target
= control target key end

     0   :  { %12 = vsyncpa [#allocation4], 0  ;;  %s5592_s0 = inlined_call_operand.hbm [shape: bf16[2,16,16,16], index: 0, kind: input, shape index: {}]   ;;  %s5593_s1 = inlined_call_operand.vmem [shape: bf16[16,4], index: 1, kind: input, shape index: {}]   ;;  %s5594_s2 = inlined_call_operand.vmem [shape: f32[1,4], index: 2, kind: input, shape index: {}]   ;;  %s5595_s3 = inlined_call_operand.vmem [shape: bf16[3,12,4], index: 3, kind: input, shape index: {}]   ;;  %s5596_s4 = inlined_call_operand.vmem [shape: f32[1,4], index: 4, kind: input, shape index: {}]   ;;  %s5597_s5 = inlined_call_operand.vmem [shape: bf16[4,16], index: 5, kind: input, shape index: {}]   ;;  %s5598_s6 = inlined_call_operand.vmem [shape: f32[1,16], index: 6, kind: input, shape index: {}]   ;;  %s5599_s7 = inlined_call_operand.hbm [shape: bf16[2,16,16,16], index: 7, kind: output, shape index: {}]  }
   0x1   :  { %14 = vsyncpa [#allocation4 + $0x1], 0 }
   0x2   :  { %15 = vsyncpa [#allocation5], 0 }
   0x3   :  { %17 = vsyncpa [#allocation5 + $0x1], 0  ;;  %s3912_s24 = smov 0   ;;  %s3914_s25 = smov 0  }
   0x4   :  { %s3916_s26 = smov 0   ;;  %s3918_s27 = smov 0  }
   0x5 LB: > { %s3933_s28 = sadd.s32 4294967295, %s3863_s27   ;;  %s3169_s29 = sadd.s32 4294967294, %s3863_s27   ;;  %s3863_s27 = sphi %s3918_s27, %s5874_s27   ;;  %s3859_s26 = sphi %s3916_s26, %s5873_s26   ;;  %s3855_s25 = sphi %s3914_s25, %s5872_s25   ;;  %s3851_s24 = sphi %s3912_s24, %s5871_s24  }
   0x6   : > { %s3937_s30 = sadd.s32 1, %s3863_s27   ;;  %s30_s8 = sadd.s32 1, %s3859_s26 }
   0x7   : > { %s27_s9 = ssub.s32 %s3863_s27, %s3937_s30  ;;  %p37_p0 = scmp.ne.s32.totalorder %s3859_s26, %s3855_s25 }
   0x8   : > { %p28_p1 = scmp.eq.s32.totalorder %s27_s9, 0  ;;  %p38_p2 = scmp.eq.s32.totalorder %s3863_s27, 0 }
   0x9   : > { %p43_p3 = scmp.ne.s32.totalorder %s3855_s25, %s3851_s24  ;;  %p44_p4 = scmp.eq.s32.totalorder %s3933_s28, 0 }
   0xa   : > { %s3949_s10 = scalar_select %p28_p1, %s3859_s26, %s30_s8  }
   0xb   : > { %p3951_p5 = por %p38_p2, %p37_p0  ;;  %p3955_p6 = por %p44_p4, %p43_p3 }
   0xc   : > { %p193_p7 = scmp.eq.s32.totalorder %s3933_s28, 1  ;;  %p199_p8 = scmp.eq.s32.totalorder %s3169_s29, 1 }
   0xd   : > { %p3708_p10 = scmp.lt.s32.totalorder %s3863_s27, 2  ;;  %s237_s15 = sand.u32 1, %s3859_s26  }
   0xe   : > { %p3962_p11 = por %p193_p7, %p37_p0  ;;  %p3966_p12 = por %p199_p8, %p43_p3 }
   0xf   : > { %s3322_s16 = sshll.u32 %s3863_s27, 11  ;;  %s3172_s17 = sshll.u32 %s237_s15, 7 }
  0x10   : > { %s5627_s13 = scalar_select %p3962_p11, 1, 0 }
  0x11   : > { %s5628_s14 = scalar_select %p3966_p12, 1, 0 }
  0x12   : > { %s3975_s20 = scalar_lea.hbm %s5592_s0, %s3322_s16  ;;  %s241_s21 = scalar_lea.vmem [#allocation3], %s3172_s17 }
  0x13   : > { %s248_s22 = sshll.u32 %s241_s21, 4  ;;  %p3979_p13 = pnand %p3708_p10, %p3951_p5  ;;  %s3983_s22 = int_to_ptr.vmem [resolvable:$true] %s248_s22 }
  0x14   : > { %s3985_s29 = scalar_lea.sflag [#allocation4], %s237_s15  ;;  %s3767_s8 = scalar_lea.hbm %s3975_s20, 2048 }
  0x15   : > { %p3768_p0 = scmp.ne.s32.totalorder %s3975_s20, %s3767_s8  ;;  %p3769_p1 = pneg %p3979_p13 }
  0x16   : > { %s3772_s16 = scalar_lea.hbm %s5592_s0, 4096  ;;  %p3773_p4 = scmp.lt.u32.totalorder %s3975_s20, %s5592_s0 }
  0x17   : > { %p3770_p2 = pnand %p3769_p1, %p3768_p0  ;;  %p3774_p5 = scmp.lt.u32.totalorder %s3772_s16, %s3767_s8 }
  0x18   : > { %p3776_p8 = scmp.lt.u32.totalorder %s3767_s8, %s3975_s20 }
  0x19   : > { %p3771_p3 = pneg %p3770_p2  ;;  %p3775_p7 = por %p3774_p5, %p3773_p4 }
  0x1b   : > { %p3777_p10 = por %p3776_p8, %p3775_p7 }
  0x1d   : > { %p3778_p9 = pnand %p3777_p10, %p3771_p3 }
  0x1f   : > { %3781 = shalt.err (!%p3778_p9)
}
  0x20   : > { %s3782_s15 = scalar_lea.vmem %s3983_s22, 2048  ;;  %s3865_s19 = smov [#allocation3]  }
  0x21   : > { %p3783_p0 = scmp.ne.s32.totalorder %s3983_s22, %s3782_s15  ;;  %s3787_s21 = sshll.u32 %s3865_s19, 4  ;;  %s3788_s21 = int_to_ptr.vmem [resolvable:$false] %s3787_s21 }
  0x22   : > { %s3789_s9 = scalar_lea.vmem %s3788_s21, 4096  ;;  %p3790_p11 = scmp.lt.s32.totalorder %s3983_s22, %s3788_s21 }
  0x23   : > { %p3785_p2 = pnand %p3783_p0, %p3769_p1  ;;  %p3791_p4 = scmp.lt.s32.totalorder %s3789_s9, %s3782_s15 }
  0x25   : > { %p3786_p12 = pneg %p3785_p2  ;;  %p3792_p5 = por %p3791_p4, %p3790_p11 }
  0x27   : > { %p3793_p7 = pnand %p3792_p5, %p3786_p12 }
  0x29   : > { %3796 = shalt.err (!%p3793_p7)
}
  0x2a   : > { %s3866_s8 = smov 64   ;;  %s3867_s11 = smov 4  }
  0x2b   : > { %3703 = dma.hbm_to_vmem [thread:$0]  (!%p3979_p13), %s3975_s20, 2048, %s3983_s22, %s3985_s29, %s3866_s8, %s3866_s8, %s3867_s11  }
  0x2c   : > { %p3175_p9 = scmp.ge.s32.totalorder %s3863_s27, 1  ;;  %p256_p1 = scmp.lt.s32.totalorder %s3863_s27, 3 }
  0x2e   : > { %p257_p3 = pnand %p3175_p9, %p256_p1 }
  0x30   : > { %260 = sbr.rel (%p257_p3) target bundleno = 1050 (0x41a), region = 48 }
  0x37   : > { %s4016_s16 = sand.u32 1, %s3855_s25  }
  0x38   : > { %s3176_s17 = sshll.u32 %s4016_s16, 7  ;;  %s263_s18 = scalar_lea.sflag [#allocation4], %s4016_s16 }
  0x39   : > { %s4022_s15 = scalar_lea.vmem [#allocation3], %s3176_s17 }
  0x3a   : > { %3842 = dma.done.wait (%p3955_p6), %s263_s18, 2048  }
  0x3b   : > { %3844 = vsyncadd (%p3955_p6), %s263_s18, 4294965248  ;;  %v3747_v0 = vld [vmem:[%s5593_s1] sm:$0xff]   ;;  %vm842_vm0 = vcmask 130048   ;;  %v3750_v3 = vld [vmem:[%s4022_s15 + $0x8] sm:$0xff]   ;;  %vm1736_vm1 = vcmask 1045504   ;;  %v298_v19 = vlaneseq  ;;  %s3868_s8 = smov 4  }
  0x3c   : > { %v3748_v1 = vld [vmem:[%s4022_s15] sm:$0xff]   ;;  %3520 = vmatprep.subr.bf16.mxu0 %v3747_v0  ;;  %3690 = vmatprep.subr.bf16.mxu1 %v3747_v0  ;;  %v3751_v4 = vld [vmem:[%s4022_s15 + $0x48] sm:$0xff]   ;;  %v3752_v5 = vld [vmem:[%s4022_s15 + $0x10] sm:$0xff]   ;;  %s3869_s11 = smov 8   ;;  %s5434_s9 = scalar_lea.vmem [#allocation6], %s3176_s17 }
  0x3d   : > { %v3749_v2 = vld [vmem:[%s4022_s15 + $0x40] sm:$0xff]   ;;  %3521 = vmatpush3.bf16.msra.mxu0 %v3747_v0  ;;  %3691 = vmatpush3.bf16.msra.mxu1 %v3747_v0  ;;  %v3753_v6 = vld [vmem:[%s4022_s15 + $0x50] sm:$0xff]   ;;  %v3754_v7 = vld [vmem:[%s4022_s15 + $0x18] sm:$0xff]   ;;  %v4068_v20 = vshrl.u32 %v298_v19, 7  ;;  %s3355_s17 = sshll.u32 %s3933_s28, 11  ;;  %s3083_s28 = scalar_lea.sflag [#allocation5], %s4016_s16 }
  0x3e   : > { %3522 = vmatprep.mubr.msk.bf16.mxu0 %vm842_vm0, %v3748_v1  ;;  %3538 = vmatprep.mubr.msk.bf16.mxu1 %vm842_vm0, %v3749_v2  ;;  %v3755_v8 = vld [vmem:[%s4022_s15 + $0x58] sm:$0xff]   ;;  %v3756_v9 = vld [vmem:[%s4022_s15 + $0x20] sm:$0xff]   ;;  %v3758_v11 = vld [vmem:[%s4022_s15 + $0x28] sm:$0xff]   ;;  %s5539_s20 = scalar_lea.hbm %s5599_s7, %s3355_s17  ;;  %p5868_p11 = scmp.ne.s32.totalorder %s5627_s13, 0 }
  0x3f   : > { %v3757_v10 = vld [vmem:[%s4022_s15 + $0x60] sm:$0xff]   ;;  %v3759_v12 = vld [vmem:[%s4022_s15 + $0x68] sm:$0xff]   ;;  %v3760_v13 = vld [vmem:[%s4022_s15 + $0x30] sm:$0xff]   ;;  %v300_v21 = vadd.s32 8, %v4068_v20  ;;  %v4072_v22 = vadd.s32 24, %v4068_v20  ;;  %v4075_v23 = vadd.s32 40, %v4068_v20 }
  0x40   : > { %3523 = vmatmul.mubr.msk.bf16.vlgmr.msra.gmra.mrb[0].mxu0 %vm842_vm0, %v3750_v3  ;;  %3539 = vmatmul.mubr.msk.bf16.vlgmr.msra.gmra.mrb[0].mxu1 %vm842_vm0, %v3751_v4  ;;  %v3761_v14 = vld [vmem:[%s4022_s15 + $0x70] sm:$0xff]   ;;  %v3762_v15 = vld [vmem:[%s4022_s15 + $0x38] sm:$0xff]   ;;  %v3764_v17 = vld [vmem:[%s5595_s3] sm:$0x3f]   ;;  %v4078_v24 = vadd.s32 56, %v4068_v20  ;;  %v4081_v25 = vadd.s32 72, %v4068_v20 }
  0x41   : > { %3526 = vmatprep.mubr.msk.bf16.mxu0 %vm842_vm0, %v3752_v5  ;;  %3542 = vmatprep.mubr.msk.bf16.mxu1 %vm842_vm0, %v3753_v6  ;;  %v3763_v16 = vld [vmem:[%s4022_s15 + $0x78] sm:$0xff]   ;;  %v1738_v18 = vsel %vm1736_vm1, %v3764_v17, 0  ;;  %v4084_v26 = vadd.s32 88, %v4068_v20  ;;  %v4087_v27 = vadd.s32 120, %v4068_v20  ;;  %v4090_v28 = vadd.s32 104, %v4068_v20  ;;  %s3870_s12 = smov [#allocation6]  }
  0x42   : > { %3692 = vmatprep.subr.msk.bf16.mxu1 %vm1736_vm1, %v3764_v17  ;;  %v4093_v29 = vadd.s32 248, %v4068_v20  ;;  %v4096_v30 = vadd.s32 16, %v4068_v20  ;;  %v342_v31 = vand.u32 15, %v300_v21  ;;  %v4100_v33 = vadd.s32 136, %v4068_v20  ;;  %v4172_v3 = vld [vmem:[%s5594_s2] ss:$0 sm:$0xff] }
  0x43   : > { %3555 = vmatpush3.bf16.msra.mxu1 %v1738_v18  ;;  %v4103_v34 = vadd.s32 152, %v4068_v20  ;;  %v4108_v37 = vadd.s32 168, %v4068_v20  ;;  %v4111_v38 = vadd.s32 32, %v4068_v20  ;;  %v4117_v42 = vadd.s32 184, %v4068_v20  ;;  %v4206_v18 = vld [vmem:[%s5595_s3 + $0x8] sm:$0x3f]  }
  0x44   : > { %v4126_v49 = vadd.s32 48, %v4068_v20  ;;  %v4129_v50 = vadd.s32 64, %v4068_v20  ;;  %v4133_v52 = vadd.s32 200, %v4068_v20  ;;  %v4136_v53 = vadd.s32 216, %v4068_v20  ;;  %5639 = vst [vmem:[#allocation16_spill] sm:$0xff] %v4206_v18  ;;  %3693 = vmatprep.subr.msk.bf16.mxu0 %vm1736_vm1, %v4206_v18  ;;  %s3801_s23 = sshll.u32 %s3870_s12, 4  ;;  %s3802_s23 = int_to_ptr.vmem [resolvable:$false] %s3801_s23 }
  0x45   : > { %v4141_v56 = vadd.s32 80, %v4068_v20  ;;  %v4144_v57 = vadd.s32 96, %v4068_v20  ;;  %v4147_v58 = vadd.s32 128, %v4068_v20  ;;  %v4150_v59 = vadd.s32 232, %v4068_v20  ;;  %s3803_s29 = scalar_lea.vmem %s3802_s23, 4096 }
  0x46   : > { %v4153_v60 = vadd.s32 112, %v4068_v20  ;;  %v4156_v61 = vadd.s32 144, %v4068_v20  ;;  %v4159_v62 = vadd.s32 160, %v4068_v20  ;;  %v4164_v1 = vadd.s32 176, %v4068_v20 }
  0x47   : > { %v4167_v2 = vadd.s32 192, %v4068_v20  ;;  %v4177_v6 = vadd.s32 208, %v4068_v20  ;;  %vm1357_vm2 = vcmp.lt.s32.totalorder %v4068_v20, 7  ;;  %vm4189_vm3 = vcmp.le.s32.totalorder %v342_v31, 14 }
  0x48   : > { %3527 = vmatmul.mubr.msk.bf16.gmra.mrb[4].mxu0 %vm842_vm0, %v3754_v7  ;;  %3543 = vmatmul.mubr.msk.bf16.gmra.mrb[4].mxu1 %vm842_vm0, %v3755_v8  ;;  %5630 = vst [vmem:[#allocation9_spill] sm:$0xff] %v4156_v61  ;;  %5631 = vst [vmem:[#allocation10_spill] sm:$0xff] %v4159_v62  ;;  %v4180_v7 = vadd.s32 224, %v4068_v20  ;;  %v5680_v61 = vand.u32 15, %v4103_v34 }
  0x49   : > { %3530 = vmatprep.mubr.msk.bf16.mxu0 %vm842_vm0, %v3756_v9  ;;  %3546 = vmatprep.mubr.msk.bf16.mxu1 %vm842_vm0, %v3757_v10  ;;  %5632 = vst [vmem:[#allocation11_spill] sm:$0xff] %v4164_v1  ;;  %5633 = vst [vmem:[#allocation12_spill] sm:$0xff] %v4167_v2 }
  0x4a   : > { %5634 = vst [vmem:[#allocation13_spill] sm:$0xff] %v4177_v6  ;;  %5635 = vst [vmem:[#allocation14_spill] sm:$0xff] %v4180_v7  ;;  %vm4477_vm12 = vcmp.le.s32.totalorder %v5680_v61, 14 }
  0x50   : > { %3531 = vmatmul.mubr.msk.bf16.gmra.mrb[8].mxu0 %vm842_vm0, %v3758_v11  ;;  %3547 = vmatmul.mubr.msk.bf16.gmra.mrb[8].mxu1 %vm842_vm0, %v3759_v12  ;;  %v4187_v11 = vadd.s32 240, %v4068_v20 }
  0x51   : > { %3534 = vmatprep.mubr.msk.bf16.mxu0 %vm842_vm0, %v3760_v13  ;;  %3550 = vmatprep.mubr.msk.bf16.mxu1 %vm842_vm0, %v3761_v14 }
  0x52   : > { %5636 = vst [vmem:[#allocation15_spill] sm:$0xff] %v4187_v11 }
  0x58   : > { %3535 = vmatmul.mubr.msk.bf16.gmra.mrb[12].mxu0 %vm842_vm0, %v3762_v15  ;;  %3551 = vmatmul.mubr.msk.bf16.gmra.mrb[12].mxu1 %vm842_vm0, %v3763_v16 }
 0x113   : > { %v3524_v12 = vpop.f32.mrb[0].mxu0  ;;  %v3540_v13 = vpop.f32.mrb[0].mxu1 }
 0x114   : > { %v934_v19 = vadd.f32 %v3524_v12, %v4172_v3  ;;  %v925_v21 = vpop.f32.mrb[1].mxu0  ;;  %v998_v10 = vadd.f32 %v3540_v13, %v4172_v3  ;;  %v989_v9 = vpop.f32.mrb[1].mxu1 }
 0x115   : > { %v926_v0 = vadd.f32 %v4172_v3, %v925_v21  ;;  %v3525_v63 = vpop.f32.mrb[2].mxu0  ;;  %v990_v54 = vadd.f32 %v4172_v3, %v989_v9  ;;  %v3541_v16 = vpop.f32.mrb[2].mxu1 }
 0x116   : > { %v4210_v17 = vmax.f32 %v934_v19, 0.0  ;;  %v937_v8 = vadd.f32 %v3525_v63, %v4172_v3  ;;  %v928_v31 = vpop.f32.mrb[3].mxu0  ;;  %v4213_v46 = vmax.f32 %v998_v10, 0.0  ;;  %v992_v21 = vpop.f32.mrb[3].mxu1  ;;  %v1001_v12 = vadd.f32 %v3541_v16, %v4172_v3 }
 0x117   : > { %v4216_v45 = vmax.f32 %v926_v0, 0.0  ;;  %v929_v44 = vadd.f32 %v4172_v3, %v928_v31  ;;  %v4219_v15 = vmax.f32 %v990_v54, 0.0  ;;  %v993_v13 = vadd.f32 %v4172_v3, %v992_v21 }
 0x118   : > { %5640 = vst [vmem:[#allocation17_spill] sm:$0xff] %v4210_v17  ;;  %v5601_v63 = vrot.slane %v4210_v17, 1  ;;  %v4226_v10 = vmax.f32 %v937_v8, 0.0  ;;  %v5655_v18 = vrot.slane %v4210_v17, 1 }
 0x119   : > { %v5602_v9 = vrot.slane %v4216_v45, 1  ;;  %v4231_v31 = vmax.f32 %v929_v44, 0.0  ;;  %v4242_v44 = vmax.f32 %v1001_v12, 0.0  ;;  %v4248_v4 = vmax.f32 %v993_v13, 0.0 }
 0x11a   : > { %5641 = vst [vmem:[#allocation18_spill] sm:$0xff] %v4226_v10  ;;  %v1503_v19 = vpack.c.bf16 %v4226_v10, %v4210_v17 }
 0x11b   : > { %5642 = vst [vmem:[#allocation19_spill] sm:$0xff] %v4231_v31  ;;  %v1326_v8 = vrot.slane %v4231_v31, 1  ;;  %v3528_v55 = vpop.f32.mrb[4].mxu0  ;;  %v1502_v21 = vpack.c.bf16 %v4231_v31, %v4216_v45  ;;  %v3544_v51 = vpop.f32.mrb[4].mxu1 }
 0x11c   : > { %v950_v16 = vadd.f32 %v3528_v55, %v4172_v3  ;;  %v941_v48 = vpop.f32.mrb[5].mxu0  ;;  %v1005_v47 = vpop.f32.mrb[5].mxu1  ;;  %v1014_v54 = vadd.f32 %v3544_v51, %v4172_v3 }
 0x11d   : > { %v942_v41 = vadd.f32 %v4172_v3, %v941_v48  ;;  %v3529_v43 = vpop.f32.mrb[6].mxu0  ;;  %1534 = vrot.lane.b32.xlu0 %v1502_v21, %s3868_s8  ;;  %v1387_v55 = vsel %vm1357_vm2, %v1326_v8, %v5601_v63  ;;  %v3545_v0 = vpop.f32.mrb[6].mxu1  ;;  %v1388_v48 = vsel %vm1357_vm2, %v5602_v9, %v1326_v8 }
 0x11e   : > { %v4258_v40 = vmax.f32 %v950_v16, 0.0  ;;  %v953_v13 = vadd.f32 %v3529_v43, %v4172_v3  ;;  %v944_v39 = vpop.f32.mrb[7].mxu0  ;;  %v1455_v21 = vsel %vm4189_vm3, %v1387_v55, 0.0  ;;  %v1008_v12 = vpop.f32.mrb[7].mxu1  ;;  %v5645_v55 = vand.u32 15, %v4072_v22 }
 0x11f   : > { %v4267_v36 = vmax.f32 %v942_v41, 0.0  ;;  %v945_v63 = vadd.f32 %v4172_v3, %v944_v39  ;;  %v1486_v16 = vpack.c.bf16 %v1455_v21, %v1388_v48  ;;  %v4282_v41 = vmax.f32 %v1014_v54, 0.0 }
 0x120   : > { %v4273_v35 = vmax.f32 %v953_v13, 0.0  ;;  %vm4286_vm4 = vcmp.le.s32.totalorder %v5645_v55, 14  ;;  %v1006_v21 = vadd.f32 %v4172_v3, %v1005_v47  ;;  %v1009_v5 = vadd.f32 %v4172_v3, %v1008_v12 }
 0x121   : > { %5643 = vst [vmem:[#allocation20_spill] sm:$0xff] %v4267_v36  ;;  %v5609_v8 = vrot.slane %v4267_v36, 1  ;;  %v4277_v14 = vmax.f32 %v945_v63, 0.0  ;;  %1536 = vrot.lane.b32.xlu0 %v1503_v19, %s3868_s8  ;;  %1582 = vrot.lane.b32.xlu1 %v1486_v16, %s3869_s11  ;;  %v1017_v19 = vadd.f32 %v3545_v0, %v4172_v3  ;;  %v4297_v16 = vld [vmem:[%s5595_s3 + $0x10] sm:$0x3f]   ;;  %v5649_v63 = vand.u32 15, %v4075_v23 }
 0x122   : > { %5648 = vst [vmem:[#allocation22_spill] sm:$0xff] %v4297_v16  ;;  %v4310_v51 = vmax.f32 %v1006_v21, 0.0  ;;  %3694 = vmatprep.subr.msk.bf16.mxu1 %vm1736_vm1, %v4297_v16  ;;  %v4342_v7 = vmax.f32 %v1009_v5, 0.0  ;;  %v5657_v17 = vrot.slane %v4267_v36, 1  ;;  %v5667_v47 = vand.u32 15, %v4090_v28 }
 0x123   : > { %5644 = vst [vmem:[#allocation21_spill] sm:$0xff] %v4277_v14  ;;  %v1330_v55 = vrot.slane %v4277_v14, 1  ;;  %v3532_v32 = vpop.f32.mrb[8].mxu0  ;;  %v3548_v48 = vpop.f32.mrb[8].mxu1  ;;  %vm4305_vm5 = vcmp.le.s32.totalorder %v5649_v63, 14  ;;  %v4312_v39 = vmax.f32 %v1017_v19, 0.0  ;;  %v1504_v22 = vpack.c.bf16 %v4277_v14, %v4267_v36 }
 0x124   : > { %v966_v0 = vadd.f32 %v3532_v32, %v4172_v3  ;;  %v957_v9 = vpop.f32.mrb[9].mxu0  ;;  %v1021_v54 = vpop.f32.mrb[9].mxu1  ;;  %v1030_v43 = vadd.f32 %v3548_v48, %v4172_v3  ;;  %v5652_v32 = vrot.slane %v4226_v10, 1  ;;  %vm4427_vm9 = vcmp.le.s32.totalorder %v5667_v47, 14 }
 0x125   : > { %v958_v23 = vadd.f32 %v4172_v3, %v957_v9  ;;  %v3533_v63 = vpop.f32.mrb[10].mxu0  ;;  %v3549_v19 = vpop.f32.mrb[10].mxu1  ;;  %1538 = vrot.lane.b32.xlu0 %v1504_v22, %s3868_s8  ;;  %v1022_v16 = vadd.f32 %v4172_v3, %v1021_v54  ;;  %v5658_v54 = vand.u32 15, %v4078_v24  ;;  %v5673_v28 = vand.u32 15, %v4100_v33 }
 0x126   : > { %v1385_v21 = vsel %vm1357_vm2, %v5652_v32, %v5609_v8  ;;  %v4327_v11 = vmax.f32 %v966_v0, 0.0  ;;  %v969_v9 = vadd.f32 %v3533_v63, %v4172_v3  ;;  %v960_v12 = vpop.f32.mrb[11].mxu0  ;;  %v1024_v48 = vpop.f32.mrb[11].mxu1  ;;  %v4348_v1 = vmax.f32 %v1030_v43, 0.0 }
 0x127   : > { %v4333_v6 = vmax.f32 %v958_v23, 0.0  ;;  %v961_v32 = vadd.f32 %v4172_v3, %v960_v12  ;;  %v5654_v43 = vrot.slane %v4226_v10, 1  ;;  %v1033_v0 = vadd.f32 %v3549_v19, %v4172_v3 }
 0x128   : > { %v4339_v8 = vmax.f32 %v969_v9, 0.0  ;;  %v1457_v9 = vsel %vm4286_vm4, %v1385_v21, 0.0  ;;  %v5656_v63 = vrot.slane %v4258_v40, 1  ;;  %v1025_v13 = vadd.f32 %v4172_v3, %v1024_v48 }
 0x129   : > { %5653 = vst [vmem:[#allocation23_spill] sm:$0xff] %v4333_v6  ;;  %v4346_v23 = vmax.f32 %v961_v32, 0.0  ;;  %v1386_v12 = vsel %vm1357_vm2, %v5655_v18, %v5654_v43  ;;  %v1384_v18 = vsel %vm1357_vm2, %v5657_v17, %v1330_v55  ;;  %vm4379_vm6 = vcmp.le.s32.totalorder %v5658_v54, 14 }
 0x12a   : > { %v1487_v14 = vpack.c.bf16 %v1457_v9, %v1386_v12  ;;  %v1383_v62 = vsel %vm1357_vm2, %v1330_v55, %v5656_v63  ;;  %v4383_v12 = vmax.f32 %v1022_v16, 0.0  ;;  %v4385_v9 = vmax.f32 %v1033_v0, 0.0 }
 0x12b   : > { %v3536_v32 = vpop.f32.mrb[12].mxu0  ;;  %v3552_v22 = vpop.f32.mrb[12].mxu1  ;;  %v1459_v63 = vsel %vm4305_vm5, %v1383_v62, 0.0  ;;  %v5661_v55 = vand.u32 15, %v4081_v25  ;;  %v4399_v54 = vmax.f32 %v1025_v13, 0.0  ;;  %v1505_v62 = vpack.c.bf16 %v4273_v35, %v4258_v40 }
 0x12c   : > { %v973_v5 = vpop.f32.mrb[13].mxu0  ;;  %v1037_v2 = vpop.f32.mrb[13].mxu1  ;;  %v982_v36 = vadd.f32 %v3536_v32, %v4172_v3  ;;  %1584 = vrot.lane.b32.xlu1 %v1487_v14, %s3869_s11  ;;  %v1488_v16 = vpack.c.bf16 %v1459_v63, %v1384_v18  ;;  %v1046_v0 = vadd.f32 %v3552_v22, %v4172_v3  ;;  %v5664_v10 = vand.u32 15, %v4084_v26 }
 0x12d   : > { %v3537_v21 = vpop.f32.mrb[14].mxu0  ;;  %v3553_v43 = vpop.f32.mrb[14].mxu1  ;;  %vm4392_vm7 = vcmp.le.s32.totalorder %v5661_v55, 14  ;;  %v974_v25 = vadd.f32 %v4172_v3, %v973_v5  ;;  %v1038_v55 = vadd.f32 %v4172_v3, %v1037_v2  ;;  %vm4444_vm11 = vcmp.le.s32.totalorder %v5673_v28, 14 }
 0x12e   : > { %v976_v17 = vpop.f32.mrb[15].mxu0  ;;  %v4396_v24 = vpop.f32.mrb[15].mxu1  ;;  %vm4410_vm8 = vcmp.le.s32.totalorder %v5664_v10, 14  ;;  %1586 = vrot.lane.b32.xlu0 %v1488_v16, %s3869_s11  ;;  %v4417_v13 = vmax.f32 %v982_v36, 0.0  ;;  %v4419_v63 = vmax.f32 %v1046_v0, 0.0  ;;  %v985_v26 = vadd.f32 %v3537_v21, %v4172_v3 }
 0x12f   : > { %v1049_v10 = vadd.f32 %v3553_v43, %v4172_v3  ;;  %v5670_v16 = vand.u32 15, %v4087_v27  ;;  %v4448_v27 = vmax.f32 %v974_v25, 0.0  ;;  %v4450_v47 = vmax.f32 %v1038_v55, 0.0 }
 0x130   : > { %v1339_v21 = vrot.slane %v4417_v13, 1  ;;  %1540 = vrot.lane.b32.xlu1 %v1505_v62, %s3868_s8  ;;  %v1506_v2 = vpack.c.bf16 %v4346_v23, %v4333_v6  ;;  %v977_v43 = vadd.f32 %v4172_v3, %v976_v17  ;;  %v5676_v62 = vrot.slane %v4333_v6, 1 }
 0x131   : > { %vm4433_vm10 = vcmp.le.s32.totalorder %v5670_v16, 14  ;;  %v4452_v16 = vmax.f32 %v985_v26, 0.0  ;;  %v4454_v22 = vmax.f32 %v1049_v10, 0.0  ;;  %v5677_v33 = vrot.slane %v4273_v35, 1 }
 0x132   : > { %v5679_v55 = vrot.slane %v4258_v40, 1  ;;  %v1337_v17 = vrot.slane %v4448_v27, 1  ;;  %1542 = vrot.lane.b32.xlu0 %v1506_v2, %s3868_s8  ;;  %v4492_v34 = vmax.f32 %v977_v43, 0.0  ;;  %v5690_v2 = vand.u32 15, %v4117_v42 }
 0x133   : > { %v1381_v28 = vsel %vm1357_vm2, %v5677_v33, %v5676_v62  ;;  %v5678_v25 = vmov %v5677_v33  ;;  %v5683_v62 = vand.u32 15, %v4108_v37  ;;  %v1340_v5 = vrot.slane %v4452_v16, 1 }
 0x134   : > { %v1382_v26 = vsel %vm1357_vm2, %v5679_v55, %v5678_v25  ;;  %v1461_v61 = vsel %vm4379_vm6, %v1381_v28, 0.0  ;;  %v5686_v37 = vrot.slane %v4327_v11, 1  ;;  %v5689_v25 = vrot.slane %v4333_v6, 1 }
 0x135   : > { %vm4483_vm13 = vcmp.le.s32.totalorder %v5683_v62, 14  ;;  %v5687_v62 = vrot.slane %v4346_v23, 1  ;;  %vm4510_vm14 = vcmp.le.s32.totalorder %v5690_v2, 14  ;;  %v1489_v19 = vpack.c.bf16 %v1461_v61, %v1382_v26 }
 0x136   : > { %v1338_v42 = vrot.slane %v4492_v34, 1  ;;  %v1508_v2 = vpack.c.bf16 %v4492_v34, %v4448_v27  ;;  %v5694_v26 = vand.u32 15, %v4133_v52  ;;  %v5698_v61 = vrot.slane %v4327_v11, 1 }
 0x137   : > { %v1379_v10 = vsel %vm1357_vm2, %v5687_v62, %v5686_v37  ;;  %v5688_v55 = vmov %v5687_v62  ;;  %v1507_v37 = vpack.c.bf16 %v4339_v8, %v4327_v11  ;;  %v5693_v62 = vrot.slane %v4339_v8, 1  ;;  %1588 = vrot.lane.b32.xlu1 %v1489_v19, %s3869_s11 }
 0x138   : > { %v1380_v32 = vsel %vm1357_vm2, %v5689_v25, %v5688_v55  ;;  %v1463_v28 = vsel %vm4392_vm7, %v1379_v10, 0.0  ;;  %vm4528_vm15 = vcmp.le.s32.totalorder %v5694_v26, 14  ;;  %v1510_v52 = vpack.c.bf16 %v4248_v4, %v4219_v15 }
 0x139   : > { %v1377_v6 = vsel %vm1357_vm2, %v5693_v62, %v1337_v17  ;;  %v1490_v55 = vpack.c.bf16 %v1463_v28, %v1380_v32  ;;  %v5697_v10 = vmov %v5693_v62  ;;  %v1509_v28 = vpack.c.bf16 %v4452_v16, %v4417_v13 }
 0x13a   : > { %v1378_v62 = vsel %vm1357_vm2, %v5698_v61, %v5697_v10  ;;  %v1465_v32 = vsel %vm4410_vm8, %v1377_v6, 0.0  ;;  %v5699_v26 = vand.u32 15, %v4136_v53  ;;  %v1375_v10 = vsel %vm1357_vm2, %v1338_v42, %v1339_v21 }
 0x13b   : > { %1590 = vrot.lane.b32.xlu0 %v1490_v55, %s3869_s11  ;;  %v1491_v25 = vpack.c.bf16 %v1465_v32, %v1378_v62  ;;  %v1376_v6 = vsel %vm1357_vm2, %v1337_v17, %v1338_v42  ;;  %v5702_v14 = vrot.slane %v4219_v15, 1  ;;  %v5703_v53 = vand.u32 15, %v4150_v59  ;;  %1544 = vrot.lane.b32.xlu1 %v1507_v37, %s3868_s8 }
 0x13c   : > { %vm4547_vm0 = vcmp.le.s32.totalorder %v5699_v26, 14  ;;  %v1467_v55 = vsel %vm4427_vm9, %v1375_v10, 0.0  ;;  %v1374_v62 = vsel %vm1357_vm2, %v1339_v21, %v1340_v5  ;;  %v5706_v42 = vrot.slane %v4213_v46, 1 }
 0x13d   : > { %v1373_v61 = vsel %vm1357_vm2, %v1340_v5, %v5702_v14  ;;  %vm4562_vm3 = vcmp.le.s32.totalorder %v5703_v53, 14  ;;  %v5707_v32 = vrot.slane %v4248_v4, 1  ;;  %vm1148_vm4 = vcmp.lt.s32.totalorder %v4068_v20, 1 }
 0x13e   : > { %v1469_v17 = vsel %vm4433_vm10, %v1373_v61, 0.0  ;;  %v1492_v14 = vpack.c.bf16 %v1467_v55, %v1376_v6  ;;  %v5709_v10 = vrot.slane %v4219_v15, 1  ;;  %v5710_v21 = vand.u32 15, %v4093_v29 }
 0x13f   : > { %v1371_v59 = vsel %vm1357_vm2, %v5707_v32, %v5706_v42  ;;  %v4579_v53 = vpack.c.bf16 %v1469_v17, %v1374_v62  ;;  %v5708_v18 = vmov %v5707_v32  ;;  %v5713_v6 = vand.u32 15, %v4068_v20  ;;  %1546 = vrot.lane.b32.xlu0 %v1508_v2, %s3868_s8  ;;  %1592 = vrot.lane.b32.xlu1 %v1491_v25, %s3869_s11  ;;  %v5787_v17 = vld [vmem:[#allocation20_spill] sm:$0xff] }
 0x140   : > { %v1372_v36 = vsel %vm1357_vm2, %v5709_v10, %v5708_v18  ;;  %v1471_v5 = vsel %vm4444_vm11, %v1371_v59, 0.0  ;;  %vm4591_vm5 = vcmp.le.s32.totalorder %v5710_v21, 14  ;;  %v1511_v0 = vpack.c.bf16 %v4242_v44, %v4213_v46 }
 0x141   : > { %vm4597_vm6 = vcmp.ge.s32.totalorder %v5713_v6, 1  ;;  %v4602_v62 = vpack.c.bf16 %v1471_v5, %v1372_v36  ;;  %v1041_v29 = vadd.f32 %v4172_v3, %v4396_v24  ;;  %v5716_v42 = vand.u32 15, %v4096_v30 }
 0x142   : > { %v5719_v37 = vrot.slane %v4310_v51, 1  ;;  %v5720_v59 = vrot.slane %v4242_v44, 1  ;;  %v5722_v24 = vrot.slane %v4213_v46, 1  ;;  %v5723_v10 = vrot.slane %v4282_v41, 1 }
 0x143   : > { %vm4612_vm7 = vcmp.ge.s32.totalorder %v5716_v42, 1  ;;  %v5724_v36 = vrot.slane %v4342_v7, 1  ;;  %v4641_v42 = vmax.f32 %v1041_v29, 0.0  ;;  %v5730_v29 = vrot.slane %v4383_v12, 1  ;;  %1594 = vrot.lane.b32.xlu0 %v1492_v14, %s3869_s11  ;;  %1548 = vrot.lane.b32.xlu1 %v1509_v28, %s3868_s8 }
 0x144   : > { %v1369_v18 = vsel %vm1357_vm2, %v5720_v59, %v5719_v37  ;;  %v5721_v3 = vmov %v5720_v59  ;;  %v5726_v21 = vmov %v5719_v37  ;;  %v5731_v33 = vrot.slane %v4312_v39, 1 }
 0x145   : > { %v1370_v30 = vsel %vm1357_vm2, %v5722_v24, %v5721_v3  ;;  %v1367_v2 = vsel %vm1357_vm2, %v5724_v36, %v5723_v10  ;;  %v5725_v5 = vmov %v5724_v36  ;;  %v1473_v37 = vsel %vm4477_vm12, %v1369_v18, 0.0 }
 0x146   : > { %v1368_v6 = vsel %vm1357_vm2, %v5726_v21, %v5725_v5  ;;  %v1475_v59 = vsel %vm4483_vm13, %v1367_v2, 0.0  ;;  %v5727_v24 = vand.u32 15, %v4111_v38  ;;  %v4655_v36 = vpack.c.bf16 %v1473_v37, %v1370_v30 }
 0x147   : > { %v4657_v5 = vpack.c.bf16 %v1475_v59, %v1368_v6  ;;  %v1365_v18 = vsel %vm1357_vm2, %v5731_v33, %v5730_v29  ;;  %v5732_v38 = vand.u32 15, %v4126_v49  ;;  %v1129_v30 = vrot.slane %v4492_v34, 7  ;;  %1550 = vrot.lane.b32.xlu0 %v1510_v52, %s3868_s8  ;;  %1596 = vrot.lane.b32.xlu1 %v4579_v53, %s3869_s11 }
 0x148   : > { %vm4651_vm8 = vcmp.ge.s32.totalorder %v5727_v24, 1  ;;  %v1354_v21 = vrot.slane %v4641_v42, 1  ;;  %v5735_v6 = vmov %v5731_v33  ;;  %v5736_v37 = vrot.slane %v4282_v41, 1 }
 0x149   : > { %vm4669_vm9 = vcmp.ge.s32.totalorder %v5732_v38, 1  ;;  %v1477_v49 = vsel %vm4510_vm14, %v1365_v18, 0.0  ;;  %v5737_v24 = vand.u32 15, %v4129_v50  ;;  %v5740_v33 = vrot.slane %v4348_v1, 1 }
 0x14a   : > { %v1366_v59 = vsel %vm1357_vm2, %v5736_v37, %v5735_v6  ;;  %v5741_v38 = vrot.slane %v4399_v54, 1  ;;  %v5743_v18 = vrot.slane %v4383_v12, 1  ;;  %v5744_v14 = vand.u32 15, %v4141_v56 }
 0x14b   : > { %vm4686_vm10 = vcmp.ge.s32.totalorder %v5737_v24, 1  ;;  %v4691_v25 = vpack.c.bf16 %v1477_v49, %v1366_v59  ;;  %v5750_v56 = vrot.slane %v4348_v1, 1  ;;  %v5751_v48 = vand.u32 15, %v4144_v57  ;;  %1598 = vrot.lane.b32.xlu0 %v4602_v62, %s3869_s11  ;;  %1552 = vrot.lane.b32.xlu1 %v1511_v0, %s3868_s8 }
 0x14c   : > { %v1363_v6 = vsel %vm1357_vm2, %v5741_v38, %v5740_v33  ;;  %v5742_v43 = vmov %v5741_v38  ;;  %vm4709_vm11 = vcmp.ge.s32.totalorder %v5744_v14, 1  ;;  %v5747_v33 = vrot.slane %v4450_v47, 1 }
 0x14d   : > { %v1364_v50 = vsel %vm1357_vm2, %v5743_v18, %v5742_v43  ;;  %v1479_v49 = vsel %vm4528_vm15, %v1363_v6, 0.0  ;;  %v5748_v38 = vrot.slane %v4385_v9, 1  ;;  %vm4731_vm12 = vcmp.ge.s32.totalorder %v5751_v48, 1 }
 0x14e   : > { %v4735_v24 = vpack.c.bf16 %v1479_v49, %v1364_v50  ;;  %v5755_v31 = vrot.slane %v4450_v47, 1  ;;  %v5756_v57 = vand.u32 15, %v4153_v60  ;;  %v5764_v26 = vrot.slane %v4216_v45, 1 }
 0x14f   : > { %v1361_v43 = vsel %vm1357_vm2, %v5748_v38, %v5747_v33  ;;  %v5749_v18 = vmov %v5748_v38  ;;  %v5754_v33 = vrot.slane %v4419_v63, 1  ;;  %v5770_v52 = vrot.slane %v4454_v22, 7  ;;  %1600 = vrot.lane.b32.xlu1 %v4655_v36, %s3869_s11 }
 0x150   : > { %v1362_v14 = vsel %vm1357_vm2, %v5750_v56, %v5749_v18  ;;  %v1481_v37 = vsel %vm4547_vm0, %v1361_v43, 0.0  ;;  %v1360_v18 = vsel %vm1357_vm2, %v5755_v31, %v1354_v21  ;;  %vm4749_vm13 = vcmp.ge.s32.totalorder %v5756_v57, 1 }
 0x151   : > { %v1359_v38 = vsel %vm1357_vm2, %v1354_v21, %v5754_v33  ;;  %v4757_v19 = vpack.c.bf16 %v1481_v37, %v1362_v14  ;;  %v5759_v31 = vrot.slane %v4454_v22, 1  ;;  %v5760_v60 = vmov %v5754_v33  ;;  %v5766_v33 = vld [vmem:[#allocation19_spill] sm:$0xff] }
 0x152   : > { %v1483_v50 = vsel %vm4562_vm3, %v1359_v38, 0.0  ;;  %v5761_v43 = vand.u32 15, %v4147_v58  ;;  %v5767_v58 = vrot.slane %v5766_v33, 7  ;;  %v5768_v38 = vrot.slane %v4216_v45, 7  ;;  %v5777_v45 = vld [vmem:[#allocation17_spill] sm:$0xff] }
 0x153   : > { %v1358_v21 = vsel %vm1357_vm2, %v5760_v60, %v5759_v31  ;;  %v4779_v28 = vpack.c.bf16 %v1483_v50, %v1360_v18  ;;  %v5765_v37 = vmov %v5759_v31  ;;  %v5771_v50 = vld [vmem:[#allocation9_spill] sm:$0xff]  ;;  %v5778_v49 = vrot.slane %v5777_v45, 7 }
 0x154   : > { %vm4771_vm14 = vcmp.ge.s32.totalorder %v5761_v43, 1  ;;  %v1389_v14 = vsel %vm1357_vm2, %v5765_v37, %v5764_v26  ;;  %v1179_v57 = vsel %vm1148_vm4, %v5768_v38, %v5767_v58  ;;  %v5769_v31 = vmov %v5768_v38  ;;  %v5775_v58 = vld [vmem:[#allocation18_spill] sm:$0xff] }
 0x155   : > { %v1180_v18 = vsel %vm1148_vm4, %v5770_v52, %v5769_v31  ;;  %v5772_v60 = vand.u32 15, %v5771_v50  ;;  %v1485_v26 = vsel %vm4591_vm5, %v1389_v14, 0.0  ;;  %v5776_v38 = vrot.slane %v5775_v58, 7 }
 0x156   : > { %v1245_v37 = vsel %vm4597_vm6, %v1180_v18, 0.0  ;;  %v5779_v31 = vmov %v5778_v49  ;;  %v5780_v52 = vrot.slane %v5766_v33, 7  ;;  %v4827_v55 = vpack.c.bf16 %v1485_v26, %v1358_v21 }
 0x157   : > { %vm4801_vm15 = vcmp.ge.s32.totalorder %v5772_v60, 1  ;;  %v1177_v3 = vsel %vm1148_vm4, %v5778_v49, %v5776_v38  ;;  %v5781_v60 = vld [vmem:[#allocation10_spill] sm:$0xff]  ;;  %v4829_v18 = vpack.c.bf16 %v1179_v57, %v1245_v37  ;;  %v5785_v38 = vld [vmem:[#allocation21_spill] sm:$0xff]  ;;  %v5788_v33 = vrot.slane %v5787_v17, 7 }
 0x158   : > { %v1178_v50 = vsel %vm1148_vm4, %v5780_v52, %v5779_v31  ;;  %v5782_v61 = vand.u32 15, %v5781_v60  ;;  %v5786_v45 = vrot.slane %v5785_v38, 7  ;;  %v5789_v52 = vld [vmem:[#allocation11_spill] sm:$0xff]  ;;  %v1145_v21 = vrot.slane %v4641_v42, 7 }
 0x159   : > { %v1247_v49 = vsel %vm4612_vm7, %v1178_v50, 0.0  ;;  %v5790_v60 = vand.u32 15, %v5789_v52  ;;  %v5793_v57 = vmov %v5788_v33  ;;  %v5794_v26 = vrot.slane %v5775_v58, 7  ;;  %v5795_v50 = vld [vmem:[#allocation16_spill] sm:$0xff] }
 0x15a   : > { %vm4823_vm2 = vcmp.ge.s32.totalorder %v5782_v61, 1  ;;  %v1175_v31 = vsel %vm1148_vm4, %v5788_v33, %v5786_v45  ;;  %v4848_v32 = vpack.c.bf16 %v1177_v3, %v1247_v49  ;;  %v1908_v45 = vsel %vm1736_vm1, %v5795_v50, 0  ;;  %v5796_v33 = vld [vmem:[#allocation12_spill] sm:$0xff]  ;;  %v5805_v50 = vld [vmem:[#allocation23_spill] sm:$0xff] }
 0x15b   : > { %vm4841_vm0 = vcmp.ge.s32.totalorder %v5790_v60, 1  ;;  %v1176_v37 = vsel %vm1148_vm4, %v5794_v26, %v5793_v57  ;;  %v5797_v52 = vand.u32 15, %v5796_v33  ;;  %3589 = vmatpush3.bf16.msra.mxu0 %v1908_v45  ;;  %v5800_v17 = vrot.slane %v4273_v35, 7  ;;  %v5807_v45 = vld [vmem:[#allocation13_spill] sm:$0xff] }
 0x15c   : > { %v1249_v53 = vsel %vm4651_vm8, %v1176_v37, 0.0  ;;  %v5801_v3 = vrot.slane %v4258_v40, 7  ;;  %v5803_v57 = vrot.slane %v5785_v38, 7  ;;  %v5804_v62 = vrot.slane %v4346_v23, 7 }
 0x15d   : > { %vm4860_vm3 = vcmp.ge.s32.totalorder %v5797_v52, 1  ;;  %v5806_v10 = vrot.slane %v5805_v50, 7  ;;  %v5808_v33 = vand.u32 15, %v5807_v45  ;;  %v5815_v45 = vld [vmem:[#allocation14_spill] sm:$0xff]  ;;  %v5820_v50 = vrot.slane %v4346_v23, 7 }
 0x15e   : > { %v1173_v58 = vsel %vm1148_vm4, %v5801_v3, %v5800_v17  ;;  %v5802_v49 = vmov %v5801_v3  ;;  %v4892_v17 = vpack.c.bf16 %v1175_v31, %v1249_v53  ;;  %v5812_v3 = vrot.slane %v4273_v35, 7 }
 0x15f   : > { %v1174_v26 = vsel %vm1148_vm4, %v5803_v57, %v5802_v49  ;;  %v1171_v37 = vsel %vm1148_vm4, %v5806_v10, %v5804_v62  ;;  %vm4888_vm5 = vcmp.ge.s32.totalorder %v5808_v33, 1  ;;  %v5811_v38 = vmov %v5806_v10 }
 0x160   : > { %v1251_v40 = vsel %vm4669_vm9, %v1174_v26, 0.0  ;;  %v1172_v49 = vsel %vm1148_vm4, %v5812_v3, %v5811_v38  ;;  %v5813_v57 = vrot.slane %v4339_v8, 7  ;;  %v5814_v62 = vrot.slane %v4327_v11, 7 }
 0x161   : > { %v5816_v31 = vand.u32 15, %v5815_v45  ;;  %v4914_v2 = vpack.c.bf16 %v1173_v58, %v1251_v40  ;;  %v1253_v35 = vsel %vm4686_vm10, %v1172_v49, 0.0  ;;  %v5821_v38 = vrot.slane %v4448_v27, 7 }
 0x162   : > { %v1169_v10 = vsel %vm1148_vm4, %v5814_v62, %v5813_v57  ;;  %v5819_v26 = vmov %v5814_v62  ;;  %v5822_v57 = vld [vmem:[#allocation15_spill] sm:$0xff]  ;;  %v4940_v11 = vpack.c.bf16 %v1171_v37, %v1253_v35  ;;  %v5827_v49 = vrot.slane %v4339_v8, 7 }
 0x163   : > { %vm4910_vm6 = vcmp.ge.s32.totalorder %v5816_v31, 1  ;;  %v1170_v33 = vsel %vm1148_vm4, %v5820_v50, %v5819_v26  ;;  %v1167_v3 = vsel %vm1148_vm4, %v5821_v38, %v1129_v30  ;;  %v5823_v58 = vand.u32 15, %v5822_v57 }
 0x164   : > { %v1255_v23 = vsel %vm4709_vm11, %v1170_v33, 0.0  ;;  %v5826_v29 = vmov %v5821_v38  ;;  %v5828_v45 = vrot.slane %v4452_v16, 7  ;;  %v5829_v31 = vrot.slane %v4417_v13, 7 }
 0x165   : > { %vm4932_vm7 = vcmp.ge.s32.totalorder %v5823_v58, 1  ;;  %v1168_v62 = vsel %vm1148_vm4, %v5827_v49, %v5826_v29  ;;  %v5830_v0 = vpack.c.bf16 %v4342_v7, %v4310_v51  ;;  %v4960_v59 = vpack.c.bf16 %v1169_v10, %v1255_v23 }
 0x166   : > { %v1165_v26 = vsel %vm1148_vm4, %v5829_v31, %v5828_v45  ;;  %v1257_v8 = vsel %vm4731_vm12, %v1168_v62, 0.0  ;;  %v5831_v27 = vmov %v5829_v31  ;;  %v5832_v35 = vrot.slane %v4248_v4, 7 }
 0x167   : > { %1554 = vrot.lane.b32.xlu0 %v5830_v0, %s3868_s8  ;;  %v1166_v37 = vsel %vm1148_vm4, %v1129_v30, %v5831_v27  ;;  %v5833_v50 = vrot.slane %v4219_v15, 7  ;;  %v4976_v38 = vpack.c.bf16 %v1167_v3, %v1257_v8  ;;  %v5835_v13 = vmov %v5828_v45 }
 0x168   : > { %v1259_v6 = vsel %vm4749_vm13, %v1166_v37, 0.0  ;;  %v5836_v30 = vrot.slane %v4242_v44, 7  ;;  %v5837_v57 = vrot.slane %v4213_v46, 7  ;;  %v5839_v15 = vmov %v5832_v35 }
 0x169   : > { %v1163_v33 = vsel %vm1148_vm4, %v5833_v50, %v5832_v35  ;;  %v5834_v10 = vmov %v5833_v50  ;;  %v4992_v23 = vpack.c.bf16 %v1165_v26, %v1259_v6  ;;  %v5840_v29 = vrot.slane %v4342_v7, 7 }
 0x16a   : > { %v1164_v34 = vsel %vm1148_vm4, %v5835_v13, %v5834_v10  ;;  %v1161_v58 = vsel %vm1148_vm4, %v5837_v57, %v5836_v30  ;;  %v5838_v3 = vmov %v5837_v57  ;;  %v5841_v49 = vrot.slane %v4310_v51, 7 }
 0x16b   : > { %v1261_v56 = vsel %vm4771_vm14, %v1164_v34, 0.0  ;;  %v1162_v16 = vsel %vm1148_vm4, %v5839_v15, %v5838_v3  ;;  %v5843_v48 = vmov %v5836_v30  ;;  %v5844_v26 = vrot.slane %v4312_v39, 7  ;;  %1602 = vrot.lane.b32.xlu0 %v4657_v5, %s3869_s11 }
 0x16c   : > { %v1159_v62 = vsel %vm1148_vm4, %v5841_v49, %v5840_v29  ;;  %v5010_v45 = vpack.c.bf16 %v1163_v33, %v1261_v56  ;;  %v1263_v46 = vsel %vm4801_vm15, %v1162_v16, 0.0  ;;  %v5842_v4 = vmov %v5841_v49 }
 0x16d   : > { %v1160_v31 = vsel %vm1148_vm4, %v5843_v48, %v5842_v4  ;;  %v5845_v0 = vrot.slane %v4282_v41, 7  ;;  %v5028_v36 = vpack.c.bf16 %v1161_v58, %v1263_v46  ;;  %v5847_v43 = vmov %v5840_v29 }
 0x16e   : > { %v1265_v51 = vsel %vm4823_vm2, %v1160_v31, 0.0  ;;  %v5848_v37 = vrot.slane %v4399_v54, 7  ;;  %v5849_v35 = vrot.slane %v4383_v12, 7  ;;  %v5851_v6 = vmov %v5844_v26 }
 0x16f   : > { %v1157_v8 = vsel %vm1148_vm4, %v5845_v0, %v5844_v26  ;;  %v5846_v44 = vmov %v5845_v0  ;;  %v5044_v5 = vpack.c.bf16 %v1159_v62, %v1265_v51  ;;  %v5852_v10 = vrot.slane %v4385_v9, 7 }
 0x170   : > { %v1158_v27 = vsel %vm1148_vm4, %v5847_v43, %v5846_v44  ;;  %v1155_v50 = vsel %vm1148_vm4, %v5849_v35, %v5848_v37  ;;  %v5850_v33 = vmov %v5849_v35  ;;  %v5853_v13 = vrot.slane %v4348_v1, 7 }
 0x171   : > { %v1267_v14 = vsel %vm4841_vm0, %v1158_v27, 0.0  ;;  %v1156_v7 = vsel %vm1148_vm4, %v5851_v6, %v5850_v33  ;;  %v5855_v58 = vmov %v5848_v37  ;;  %v5856_v3 = vrot.slane %v4450_v47, 7 }
 0x172   : > { %v1153_v34 = vsel %vm1148_vm4, %v5853_v13, %v5852_v10  ;;  %v5060_v30 = vpack.c.bf16 %v1157_v8, %v1267_v14  ;;  %v1269_v61 = vsel %vm4860_vm3, %v1156_v7, 0.0  ;;  %v5854_v57 = vmov %v5853_v13 }
 0x173   : > { %v1154_v56 = vsel %vm1148_vm4, %v5855_v58, %v5854_v57  ;;  %v1151_v15 = vsel %vm1148_vm4, %v5856_v3, %v1145_v21  ;;  %v5857_v16 = vpack.c.bf16 %v4312_v39, %v4282_v41  ;;  %v5080_v60 = vpack.c.bf16 %v1155_v50, %v1269_v61 }
 0x174   : > { %v1271_v29 = vsel %vm4888_vm5, %v1154_v56, 0.0  ;;  %v5858_v49 = vmov %v5856_v3  ;;  %v5859_v62 = vmov %v5852_v10  ;;  %v5860_v4 = vrot.slane %v4454_v22, 7 }
 0x175   : > { %1556 = vrot.lane.b32.xlu1 %v5857_v16, %s3868_s8  ;;  %v1152_v46 = vsel %vm1148_vm4, %v5859_v62, %v5858_v49  ;;  %v5861_v48 = vrot.slane %v4419_v63, 7  ;;  %v5862_v41 = vpack.c.bf16 %v4399_v54, %v4383_v12  ;;  %v5100_v52 = vpack.c.bf16 %v1153_v34, %v1271_v29 }
 0x176   : > { %v1273_v31 = vsel %vm4910_vm6, %v1152_v46, 0.0  ;;  %v5864_v12 = vpack.c.bf16 %v4385_v9, %v4348_v1  ;;  %v5865_v20 = vpack.c.bf16 %v4641_v42, %v4450_v47  ;;  %v5866_v54 = vpack.c.bf16 %v4454_v22, %v4419_v63 }
 0x177   : > { %v1149_v39 = vsel %vm1148_vm4, %v5861_v48, %v5860_v4  ;;  %1558 = vrot.lane.b32.xlu0 %v5862_v41, %s3868_s8  ;;  %v5863_v26 = vmov %v5861_v48  ;;  %v5110_v8 = vpack.c.bf16 %v1151_v15, %v1273_v31  ;;  %vm1663_vm8 = vcmask 64512  }
 0x178   : > { %v1150_v0 = vsel %vm1148_vm4, %v1145_v21, %v5863_v26  ;;  %vm1614_vm4 = vcmask 31744   ;;  %vm1703_vm9 = vcmask 97280   ;;  %vm3049_vm10 = vcmask 125952  }
 0x179   : > { %v1275_v51 = vsel %vm4932_vm7, %v1150_v0, 0.0  ;;  %1604 = vrot.lane.b32.xlu1 %v4691_v25, %s3869_s11 }
 0x17a   : > { %v5114_v44 = vpack.c.bf16 %v1149_v39, %v1275_v51 }
 0x17b   : > { %1606 = vrot.lane.b32.xlu0 %v4735_v24, %s3869_s11 }
 0x17d   : > { %1560 = vrot.lane.b32.xlu1 %v5864_v12, %s3868_s8 }
 0x17f   : > { %1562 = vrot.lane.b32.xlu0 %v5865_v20, %s3868_s8 }
 0x181   : > { %1608 = vrot.lane.b32.xlu1 %v4757_v19, %s3869_s11  ;;  %v5867_v19 = vld [vmem:[#allocation22_spill] sm:$0xff] }
 0x183   : > { %1610 = vrot.lane.b32.xlu0 %v4779_v28, %s3869_s11  ;;  %v2080_v28 = vsel %vm1736_vm1, %v5867_v19, 0  ;;  %vm2628_vm1 = vcmask 1041408  }
 0x185   : > { %1564 = vrot.lane.b32.xlu1 %v5866_v54, %s3868_s8 }
 0x189   : > { %1612 = vrot.lane.b32.xlu1 %v4827_v55, %s3869_s11 }
 0x18f   : > { %v1535_v1 = vpop.permute.xlu0 %1534 }
 0x190   : > { %v1617_v9 = vsel %vm1614_vm4, %v4829_v18, %v1535_v1 }
 0x193   : > { %v1583_v47 = vpop.permute.xlu1 %1582  ;;  %v1537_v22 = vpop.permute.xlu0 %1536 }
 0x194   : > { %v5141_v42 = vsel %vm1663_vm8, %v1617_v9, %v1583_v47  ;;  %v1620_v25 = vsel %vm1614_vm4, %v4848_v32, %v1537_v22 }
 0x195   : > { %3556 = vmatprep.mubr.msk.bf16.mxu1 %vm1703_vm9, %v5141_v42  ;;  %3590 = vmatprep.mubr.msk.bf16.mxu0 %vm1703_vm9, %v5141_v42 }
 0x197   : > { %v1539_v63 = vpop.permute.xlu0 %1538 }
 0x198   : > { %v1623_v18 = vsel %vm1614_vm4, %v4892_v17, %v1539_v63 }
 0x19e   : > { %v1585_v24 = vpop.permute.xlu1 %1584 }
 0x19f   : > { %v5152_v55 = vsel %vm1663_vm8, %v1620_v25, %v1585_v24 }
 0x1a0   : > { %v1587_v21 = vpop.permute.xlu0 %1586  ;;  %3557 = vmatmul.mubr.msk.bf16.vlgmr.msra.gmra.mrb[16].mxu1 %vm1703_vm9, %v5152_v55  ;;  %3591 = vmatmul.mubr.msk.bf16.vlgmr.msra.gmra.mrb[16].mxu0 %vm1703_vm9, %v5152_v55 }
 0x1a1   : > { %v5161_v53 = vsel %vm1663_vm8, %v1623_v18, %v1587_v21  ;;  %3623 = vmatpush3.bf16.msra.mxu1 %v2080_v28 }
 0x1a2   : > { %3560 = vmatprep.mubr.msk.bf16.mxu1 %vm1703_vm9, %v5161_v53  ;;  %3594 = vmatprep.mubr.msk.bf16.mxu0 %vm1703_vm9, %v5161_v53  ;;  %v1541_v32 = vpop.permute.xlu1 %1540 }
 0x1a3   : > { %v1626_v17 = vsel %vm1614_vm4, %v4914_v2, %v1541_v32 }
 0x1a4   : > { %v1543_v40 = vpop.permute.xlu0 %1542 }
 0x1a5   : > { %v1629_v27 = vsel %vm1614_vm4, %v4940_v11, %v1543_v40 }
 0x1a9   : > { %v1589_v43 = vpop.permute.xlu1 %1588 }
 0x1aa   : > { %v5172_v37 = vsel %vm1663_vm8, %v1626_v17, %v1589_v43 }
 0x1ab   : > { %3561 = vmatmul.mubr.msk.bf16.gmra.mrb[20].mxu1 %vm1703_vm9, %v5172_v37  ;;  %3595 = vmatmul.mubr.msk.bf16.gmra.mrb[20].mxu0 %vm1703_vm9, %v5172_v37 }
 0x1ad   : > { %v1591_v35 = vpop.permute.xlu0 %1590  ;;  %v1545_v2 = vpop.permute.xlu1 %1544 }
 0x1ae   : > { %v5175_v50 = vsel %vm1663_vm8, %v1629_v27, %v1591_v35  ;;  %v1632_v14 = vsel %vm1614_vm4, %v4960_v59, %v1545_v2 }
 0x1af   : > { %3564 = vmatprep.mubr.msk.bf16.mxu1 %vm1703_vm9, %v5175_v50  ;;  %3598 = vmatprep.mubr.msk.bf16.mxu0 %vm1703_vm9, %v5175_v50 }
 0x1b1   : > { %v1547_v11 = vpop.permute.xlu0 %1546  ;;  %v1593_v33 = vpop.permute.xlu1 %1592 }
 0x1b2   : > { %v1635_v6 = vsel %vm1614_vm4, %v4976_v38, %v1547_v11  ;;  %v5190_v7 = vsel %vm1663_vm8, %v1632_v14, %v1593_v33 }
 0x1b3   : > { %3565 = vmatmul.mubr.msk.bf16.gmra.mrb[24].mxu1 %vm1703_vm9, %v5190_v7  ;;  %3599 = vmatmul.mubr.msk.bf16.gmra.mrb[24].mxu0 %vm1703_vm9, %v5190_v7 }
 0x1b5   : > { %v1595_v10 = vpop.permute.xlu0 %1594  ;;  %v1549_v59 = vpop.permute.xlu1 %1548 }
 0x1b6   : > { %v5193_v13 = vsel %vm1663_vm8, %v1635_v6, %v1595_v10  ;;  %v1638_v34 = vsel %vm1614_vm4, %v4992_v23, %v1549_v59 }
 0x1b7   : > { %3568 = vmatprep.mubr.msk.bf16.mxu1 %vm1703_vm9, %v5193_v13  ;;  %3602 = vmatprep.mubr.msk.bf16.mxu0 %vm1703_vm9, %v5193_v13 }
 0x1b9   : > { %v1551_v38 = vpop.permute.xlu0 %1550  ;;  %v1597_v61 = vpop.permute.xlu1 %1596 }
 0x1ba   : > { %v1641_v57 = vsel %vm1614_vm4, %v5010_v45, %v1551_v38  ;;  %v1679_v58 = vsel %vm1663_vm8, %v1638_v34, %v1597_v61 }
 0x1bb   : > { %3569 = vmatmul.mubr.msk.bf16.gmra.mrb[28].mxu1 %vm1703_vm9, %v1679_v58  ;;  %3603 = vmatmul.mubr.msk.bf16.gmra.mrb[28].mxu0 %vm1703_vm9, %v1679_v58 }
 0x1bd   : > { %v1599_v56 = vpop.permute.xlu0 %1598  ;;  %v1553_v15 = vpop.permute.xlu1 %1552 }
 0x1be   : > { %v1681_v3 = vsel %vm1663_vm8, %v1641_v57, %v1599_v56  ;;  %v1644_v23 = vsel %vm1614_vm4, %v5028_v36, %v1553_v15 }
 0x1bf   : > { %3572 = vmatprep.mubr.msk.bf16.mxu1 %vm1703_vm9, %v1681_v3  ;;  %3606 = vmatprep.mubr.msk.bf16.mxu0 %vm1703_vm9, %v1681_v3 }
 0x1c1   : > { %v1601_v29 = vpop.permute.xlu1 %1600 }
 0x1c2   : > { %v1683_v49 = vsel %vm1663_vm8, %v1644_v23, %v1601_v29 }
 0x1c3   : > { %3573 = vmatmul.mubr.msk.bf16.gmra.mrb[32].mxu1 %vm1703_vm9, %v1683_v49  ;;  %3607 = vmatmul.mubr.msk.bf16.gmra.mrb[32].mxu0 %vm1703_vm9, %v1683_v49 }
 0x1d9   : > { %v1555_v16 = vpop.permute.xlu0 %1554 }
 0x1da   : > { %v1647_v45 = vsel %vm1614_vm4, %v5044_v5, %v1555_v16 }
 0x1dd   : > { %v1603_v62 = vpop.permute.xlu0 %1602 }
 0x1de   : > { %v1685_v46 = vsel %vm1663_vm8, %v1647_v45, %v1603_v62 }
 0x1df   : > { %3576 = vmatprep.mubr.msk.bf16.mxu1 %vm1703_vm9, %v1685_v46  ;;  %3610 = vmatprep.mubr.msk.bf16.mxu0 %vm1703_vm9, %v1685_v46 }
 0x1e7   : > { %v1557_v4 = vpop.permute.xlu1 %1556 }
 0x1e8   : > { %v1650_v36 = vsel %vm1614_vm4, %v5060_v30, %v1557_v4 }
 0x1e9   : > { %v1559_v48 = vpop.permute.xlu0 %1558 }
 0x1ea   : > { %v1653_v5 = vsel %vm1614_vm4, %v5080_v60, %v1559_v48 }
 0x1eb   : > { %v1605_v39 = vpop.permute.xlu1 %1604 }
 0x1ec   : > { %v1687_v41 = vsel %vm1663_vm8, %v1650_v36, %v1605_v39 }
 0x1ed   : > { %v1607_v31 = vpop.permute.xlu0 %1606  ;;  %3577 = vmatmul.mubr.msk.bf16.gmra.mrb[36].mxu1 %vm1703_vm9, %v1687_v41  ;;  %3611 = vmatmul.mubr.msk.bf16.gmra.mrb[36].mxu0 %vm1703_vm9, %v1687_v41 }
 0x1ee   : > { %v1689_v26 = vsel %vm1663_vm8, %v1653_v5, %v1607_v31 }
 0x1ef   : > { %3580 = vmatprep.mubr.msk.bf16.mxu1 %vm1703_vm9, %v1689_v26  ;;  %3614 = vmatprep.mubr.msk.bf16.mxu0 %vm1703_vm9, %v1689_v26  ;;  %v1561_v0 = vpop.permute.xlu1 %1560 }
 0x1f0   : > { %v1656_v30 = vsel %vm1614_vm4, %v5100_v52, %v1561_v0 }
 0x1f1   : > { %v1563_v51 = vpop.permute.xlu0 %1562 }
 0x1f2   : > { %v1659_v60 = vsel %vm1614_vm4, %v5110_v8, %v1563_v51 }
 0x1f3   : > { %v1609_v12 = vpop.permute.xlu1 %1608 }
 0x1f4   : > { %v1691_v20 = vsel %vm1663_vm8, %v1656_v30, %v1609_v12 }
 0x1f5   : > { %v1611_v54 = vpop.permute.xlu0 %1610  ;;  %3581 = vmatmul.mubr.msk.bf16.gmra.mrb[40].mxu1 %vm1703_vm9, %v1691_v20  ;;  %3615 = vmatmul.mubr.msk.bf16.gmra.mrb[40].mxu0 %vm1703_vm9, %v1691_v20 }
 0x1f6   : > { %v1693_v1 = vsel %vm1663_vm8, %v1659_v60, %v1611_v54 }
 0x1f7   : > { %3584 = vmatprep.mubr.msk.bf16.mxu1 %vm1703_vm9, %v1693_v1  ;;  %3618 = vmatprep.mubr.msk.bf16.mxu0 %vm1703_vm9, %v1693_v1  ;;  %v1565_v9 = vpop.permute.xlu1 %1564 }
 0x1f8   : > { %v1662_v52 = vsel %vm1614_vm4, %v5114_v44, %v1565_v9  ;;  %v2572_v44 = vld [vmem:[%s5597_s5] sm:$0x3] }
 0x1f9   : > { %3695 = vmatprep.subr.msk.bf16.mxu0 %vm2628_vm1, %v2572_v44 }
 0x1fb   : > { %v1613_v47 = vpop.permute.xlu1 %1612 }
 0x1fc   : > { %v1695_v8 = vsel %vm1663_vm8, %v1662_v52, %v1613_v47 }
 0x1fd   : > { %3585 = vmatmul.mubr.msk.bf16.gmra.mrb[44].mxu1 %vm1703_vm9, %v1695_v8  ;;  %3619 = vmatmul.mubr.msk.bf16.gmra.mrb[44].mxu0 %vm1703_vm9, %v1695_v8 }
 0x1fe   : > { %3624 = vmatprep.mubr.msk.bf16.mxu1 %vm1703_vm9, %v5141_v42  ;;  %v2630_v42 = vsel %vm2628_vm1, %v2572_v44, 0 }
 0x1ff   : > { %3657 = vmatpush3.bf16.msra.mxu0 %v2630_v42 }
 0x205   : > { %3625 = vmatmul.mubr.msk.bf16.vlgmr.msra.gmra.mrb[48].mxu1 %vm1703_vm9, %v5152_v55 }
 0x206   : > { %3628 = vmatprep.mubr.msk.bf16.mxu1 %vm1703_vm9, %v5161_v53 }
 0x20d   : > { %3629 = vmatmul.mubr.msk.bf16.gmra.mrb[52].mxu1 %vm1703_vm9, %v5172_v37 }
 0x20e   : > { %3632 = vmatprep.mubr.msk.bf16.mxu1 %vm1703_vm9, %v5175_v50 }
 0x215   : > { %3633 = vmatmul.mubr.msk.bf16.gmra.mrb[56].mxu1 %vm1703_vm9, %v5190_v7 }
 0x216   : > { %3636 = vmatprep.mubr.msk.bf16.mxu1 %vm1703_vm9, %v5193_v13 }
 0x21d   : > { %3637 = vmatmul.mubr.msk.bf16.gmra.mrb[60].mxu1 %vm1703_vm9, %v1679_v58 }
 0x21e   : > { %3640 = vmatprep.mubr.msk.bf16.mxu1 %vm1703_vm9, %v1681_v3 }
 0x225   : > { %3641 = vmatmul.mubr.msk.bf16.gmra.mrb[64].mxu1 %vm1703_vm9, %v1683_v49 }
 0x226   : > { %3644 = vmatprep.mubr.msk.bf16.mxu1 %vm1703_vm9, %v1685_v46 }
 0x22d   : > { %3645 = vmatmul.mubr.msk.bf16.gmra.mrb[68].mxu1 %vm1703_vm9, %v1687_v41 }
 0x22e   : > { %3648 = vmatprep.mubr.msk.bf16.mxu1 %vm1703_vm9, %v1689_v26 }
 0x235   : > { %3649 = vmatmul.mubr.msk.bf16.gmra.mrb[72].mxu1 %vm1703_vm9, %v1691_v20 }
 0x236   : > { %3652 = vmatprep.mubr.msk.bf16.mxu1 %vm1703_vm9, %v1693_v1 }
 0x23d   : > { %3653 = vmatmul.mubr.msk.bf16.gmra.mrb[76].mxu1 %vm1703_vm9, %v1695_v8 }
 0x273   : > { %v3558_v22 = vpop.f32.mrb[16].mxu1  ;;  %v3592_v63 = vpop.f32.mrb[16].mxu0 }
 0x274   : > { %2243 = vst.msk [vmem:[#allocation2 + $0x10] sm:$0xff] %vm1614_vm4, %v3592_v63  ;;  %v1774_v25 = vpop.f32.mrb[17].mxu1  ;;  %v1944_v24 = vpop.f32.mrb[17].mxu0 }
 0x275   : > { %2241 = vst.msk [vmem:[#allocation2] sm:$0xff] %vm1614_vm4, %v1944_v24  ;;  %v3559_v19 = vpop.f32.mrb[18].mxu1  ;;  %v3593_v28 = vpop.f32.mrb[18].mxu0 }
 0x276   : > { %2244 = vst.msk [vmem:[#allocation2 + $0x18] sm:$0xff] %vm1614_vm4, %v3593_v28  ;;  %v1777_v55 = vpop.f32.mrb[19].mxu1  ;;  %v1947_v18 = vpop.f32.mrb[19].mxu0 }
 0x277   : > { %2242 = vst.msk [vmem:[#allocation2 + $0x8] sm:$0xff] %vm1614_vm4, %v1947_v18 }
 0x27b   : > { %v2273_v21 = vld [vmem:[#allocation2 + $0x10] sm:$0xff] }
 0x27c   : > { %v2303_v53 = vadd.f32 %v2273_v21, %v1774_v25 }
 0x27d   : > { %v2274_v32 = vld [vmem:[#allocation2 + $0x18] sm:$0xff] }
 0x27e   : > { %2333 = vst.msk [vmem:[#allocation2 + $0x10] sm:$0xff] %vm1614_vm4, %v2303_v53  ;;  %v2304_v40 = vadd.f32 %v2274_v32, %v1777_v55  ;;  %v3562_v17 = vpop.f32.mrb[20].mxu1  ;;  %v3596_v43 = vpop.f32.mrb[20].mxu0 }
 0x27f   : > { %2247 = vst.msk [vmem:[#allocation2 + $0x30] sm:$0xff] %vm1614_vm4, %v3596_v43  ;;  %v1790_v27 = vpop.f32.mrb[21].mxu1  ;;  %v1960_v37 = vpop.f32.mrb[21].mxu0 }
 0x280   : > { %2334 = vst.msk [vmem:[#allocation2 + $0x18] sm:$0xff] %vm1614_vm4, %v2304_v40  ;;  %2245 = vst.msk [vmem:[#allocation2 + $0x20] sm:$0xff] %vm1614_vm4, %v1960_v37  ;;  %v3563_v35 = vpop.f32.mrb[22].mxu1  ;;  %v3597_v50 = vpop.f32.mrb[22].mxu0 }
 0x281   : > { %2248 = vst.msk [vmem:[#allocation2 + $0x38] sm:$0xff] %vm1614_vm4, %v3597_v50  ;;  %v1793_v2 = vpop.f32.mrb[23].mxu1  ;;  %v1963_v11 = vpop.f32.mrb[23].mxu0 }
 0x282   : > { %2246 = vst.msk [vmem:[#allocation2 + $0x28] sm:$0xff] %vm1614_vm4, %v1963_v11 }
 0x286   : > { %v2277_v14 = vld [vmem:[#allocation2 + $0x30] sm:$0xff]  ;;  %v3566_v33 = vpop.f32.mrb[24].mxu1  ;;  %v3600_v6 = vpop.f32.mrb[24].mxu0 }
 0x287   : > { %v2307_v7 = vadd.f32 %v2277_v14, %v1790_v27  ;;  %v2275_v10 = vld [vmem:[#allocation2 + $0x20] sm:$0xff]  ;;  %2251 = vst.msk [vmem:[#allocation2 + $0x50] sm:$0xff] %vm1614_vm4, %v3600_v6  ;;  %v1806_v13 = vpop.f32.mrb[25].mxu1  ;;  %v1976_v59 = vpop.f32.mrb[25].mxu0 }
 0x288   : > { %v2305_v38 = vadd.f32 %v3558_v22, %v2275_v10  ;;  %v2278_v34 = vld [vmem:[#allocation2 + $0x38] sm:$0xff]  ;;  %2249 = vst.msk [vmem:[#allocation2 + $0x40] sm:$0xff] %vm1614_vm4, %v1976_v59  ;;  %v3567_v61 = vpop.f32.mrb[26].mxu1  ;;  %v3601_v57 = vpop.f32.mrb[26].mxu0 }
 0x289   : > { %2337 = vst.msk [vmem:[#allocation2 + $0x30] sm:$0xff] %vm1614_vm4, %v2307_v7  ;;  %v2308_v58 = vadd.f32 %v2278_v34, %v1793_v2  ;;  %v2276_v56 = vld [vmem:[#allocation2 + $0x28] sm:$0xff]  ;;  %2252 = vst.msk [vmem:[#allocation2 + $0x58] sm:$0xff] %vm1614_vm4, %v3601_v57  ;;  %v1809_v3 = vpop.f32.mrb[27].mxu1  ;;  %v1979_v15 = vpop.f32.mrb[27].mxu0 }
 0x28a   : > { %2335 = vst.msk [vmem:[#allocation2 + $0x20] sm:$0xff] %vm1614_vm4, %v2305_v38  ;;  %v2306_v16 = vadd.f32 %v3559_v19, %v2276_v56  ;;  %2250 = vst.msk [vmem:[#allocation2 + $0x48] sm:$0xff] %vm1614_vm4, %v1979_v15 }
 0x28b   : > { %2338 = vst.msk [vmem:[#allocation2 + $0x38] sm:$0xff] %vm1614_vm4, %v2308_v58 }
 0x28c   : > { %2336 = vst.msk [vmem:[#allocation2 + $0x28] sm:$0xff] %vm1614_vm4, %v2306_v16 }
 0x28e   : > { %v2281_v23 = vld [vmem:[#allocation2 + $0x50] sm:$0xff]  ;;  %v3570_v29 = vpop.f32.mrb[28].mxu1  ;;  %v3604_v45 = vpop.f32.mrb[28].mxu0 }
 0x28f   : > { %v2311_v49 = vadd.f32 %v2281_v23, %v1806_v13  ;;  %v2279_v62 = vld [vmem:[#allocation2 + $0x40] sm:$0xff]  ;;  %2255 = vst.msk [vmem:[#allocation2 + $0x70] sm:$0xff] %vm1614_vm4, %v3604_v45  ;;  %v1822_v46 = vpop.f32.mrb[29].mxu1  ;;  %v1992_v4 = vpop.f32.mrb[29].mxu0 }
 0x290   : > { %v2309_v48 = vadd.f32 %v3562_v17, %v2279_v62  ;;  %v2282_v36 = vld [vmem:[#allocation2 + $0x58] sm:$0xff]  ;;  %2253 = vst.msk [vmem:[#allocation2 + $0x60] sm:$0xff] %vm1614_vm4, %v1992_v4  ;;  %v3571_v39 = vpop.f32.mrb[30].mxu1  ;;  %v3605_v5 = vpop.f32.mrb[30].mxu0 }
 0x291   : > { %2341 = vst.msk [vmem:[#allocation2 + $0x50] sm:$0xff] %vm1614_vm4, %v2311_v49  ;;  %v2312_v41 = vadd.f32 %v2282_v36, %v1809_v3  ;;  %v2280_v31 = vld [vmem:[#allocation2 + $0x48] sm:$0xff]  ;;  %2256 = vst.msk [vmem:[#allocation2 + $0x78] sm:$0xff] %vm1614_vm4, %v3605_v5  ;;  %v1825_v26 = vpop.f32.mrb[31].mxu1  ;;  %v1995_v0 = vpop.f32.mrb[31].mxu0 }
 0x292   : > { %2339 = vst.msk [vmem:[#allocation2 + $0x40] sm:$0xff] %vm1614_vm4, %v2309_v48  ;;  %v2310_v51 = vadd.f32 %v3563_v35, %v2280_v31  ;;  %2254 = vst.msk [vmem:[#allocation2 + $0x68] sm:$0xff] %vm1614_vm4, %v1995_v0 }
 0x293   : > { %2342 = vst.msk [vmem:[#allocation2 + $0x58] sm:$0xff] %vm1614_vm4, %v2312_v41 }
 0x294   : > { %2340 = vst.msk [vmem:[#allocation2 + $0x48] sm:$0xff] %vm1614_vm4, %v2310_v51 }
 0x296   : > { %v2285_v30 = vld [vmem:[#allocation2 + $0x70] sm:$0xff]  ;;  %v3574_v12 = vpop.f32.mrb[32].mxu1  ;;  %v3608_v60 = vpop.f32.mrb[32].mxu0 }
 0x297   : > { %v2315_v20 = vadd.f32 %v2285_v30, %v1822_v46  ;;  %v2283_v54 = vld [vmem:[#allocation2 + $0x60] sm:$0xff]  ;;  %2259 = vst.msk [vmem:[#allocation2 + $0x90] sm:$0xff] %vm1614_vm4, %v3608_v60  ;;  %v1838_v1 = vpop.f32.mrb[33].mxu1  ;;  %v2008_v9 = vpop.f32.mrb[33].mxu0 }
 0x298   : > { %v2313_v52 = vadd.f32 %v3566_v33, %v2283_v54  ;;  %v2286_v47 = vld [vmem:[#allocation2 + $0x78] sm:$0xff]  ;;  %2257 = vst.msk [vmem:[#allocation2 + $0x80] sm:$0xff] %vm1614_vm4, %v2008_v9  ;;  %v3575_v8 = vpop.f32.mrb[34].mxu1  ;;  %v3609_v44 = vpop.f32.mrb[34].mxu0  ;;  %v2363_v60 = vld [vmem:[#allocation2] sm:$0xff] }
 0x299   : > { %2345 = vst.msk [vmem:[#allocation2 + $0x70] sm:$0xff] %vm1614_vm4, %v2315_v20  ;;  %v2316_v42 = vadd.f32 %v2286_v47, %v1825_v26  ;;  %v2284_v22 = vld [vmem:[#allocation2 + $0x68] sm:$0xff]  ;;  %2260 = vst.msk [vmem:[#allocation2 + $0x98] sm:$0xff] %vm1614_vm4, %v3609_v44  ;;  %v1841_v63 = vpop.f32.mrb[35].mxu1  ;;  %v2011_v25 = vpop.f32.mrb[35].mxu0 }
 0x29a   : > { %2343 = vst.msk [vmem:[#allocation2 + $0x60] sm:$0xff] %vm1614_vm4, %v2313_v52  ;;  %v2314_v24 = vadd.f32 %v3567_v61, %v2284_v22  ;;  %2258 = vst.msk [vmem:[#allocation2 + $0x88] sm:$0xff] %vm1614_vm4, %v2011_v25  ;;  %v2364_v44 = vld [vmem:[#allocation2 + $0x8] sm:$0xff] }
 0x29b   : > { %2346 = vst.msk [vmem:[#allocation2 + $0x78] sm:$0xff] %vm1614_vm4, %v2316_v42 }
 0x29c   : > { %2344 = vst.msk [vmem:[#allocation2 + $0x68] sm:$0xff] %vm1614_vm4, %v2314_v24 }
 0x29e   : > { %v2289_v19 = vld [vmem:[#allocation2 + $0x90] sm:$0xff] }
 0x29f   : > { %v2319_v18 = vadd.f32 %v2289_v19, %v1838_v1  ;;  %v2287_v21 = vld [vmem:[#allocation2 + $0x80] sm:$0xff] }
 0x2a0   : > { %v2317_v40 = vadd.f32 %v3570_v29, %v2287_v21  ;;  %v2290_v17 = vld [vmem:[#allocation2 + $0x98] sm:$0xff] }
 0x2a1   : > { %2349 = vst.msk [vmem:[#allocation2 + $0x90] sm:$0xff] %vm1614_vm4, %v2319_v18  ;;  %v2320_v37 = vadd.f32 %v2290_v17, %v1841_v63  ;;  %v2288_v35 = vld [vmem:[#allocation2 + $0x88] sm:$0xff] }
 0x2a2   : > { %2347 = vst.msk [vmem:[#allocation2 + $0x80] sm:$0xff] %vm1614_vm4, %v2317_v40  ;;  %v2318_v11 = vadd.f32 %v3571_v39, %v2288_v35  ;;  %v2368_v17 = vld [vmem:[#allocation2 + $0x28] sm:$0xff]  ;;  %v2366_v35 = vld [vmem:[#allocation2 + $0x18] sm:$0xff] }
 0x2a3   : > { %2350 = vst.msk [vmem:[#allocation2 + $0x98] sm:$0xff] %vm1614_vm4, %v2320_v37 }
 0x2a4   : > { %2348 = vst.msk [vmem:[#allocation2 + $0x88] sm:$0xff] %vm1614_vm4, %v2318_v11 }
 0x2c0   : > { %v3578_v28 = vpop.f32.mrb[36].mxu1  ;;  %v3612_v55 = vpop.f32.mrb[36].mxu0 }
 0x2c1   : > { %2263 = vst.msk [vmem:[#allocation2 + $0xb0] sm:$0xff] %vm1614_vm4, %v3612_v55  ;;  %v1854_v53 = vpop.f32.mrb[37].mxu1  ;;  %v2024_v32 = vpop.f32.mrb[37].mxu0  ;;  %v5341_v55 = vld [vmem:[%s5596_s4] ss:$0 sm:$0xff] }
 0x2c2   : > { %2261 = vst.msk [vmem:[#allocation2 + $0xa0] sm:$0xff] %vm1614_vm4, %v2024_v32  ;;  %v3579_v43 = vpop.f32.mrb[38].mxu1  ;;  %v3613_v27 = vpop.f32.mrb[38].mxu0 }
 0x2c3   : > { %2264 = vst.msk [vmem:[#allocation2 + $0xb8] sm:$0xff] %vm1614_vm4, %v3613_v27  ;;  %v1857_v50 = vpop.f32.mrb[39].mxu1  ;;  %v2027_v2 = vpop.f32.mrb[39].mxu0 }
 0x2c4   : > { %2262 = vst.msk [vmem:[#allocation2 + $0xa8] sm:$0xff] %vm1614_vm4, %v2027_v2 }
 0x2c8   : > { %v2293_v14 = vld [vmem:[#allocation2 + $0xb0] sm:$0xff]  ;;  %v3582_v33 = vpop.f32.mrb[40].mxu1  ;;  %v3616_v6 = vpop.f32.mrb[40].mxu0 }
 0x2c9   : > { %v2323_v7 = vadd.f32 %v2293_v14, %v1854_v53  ;;  %v2291_v10 = vld [vmem:[#allocation2 + $0xa0] sm:$0xff]  ;;  %2267 = vst.msk [vmem:[#allocation2 + $0xd0] sm:$0xff] %vm1614_vm4, %v3616_v6  ;;  %v1870_v13 = vpop.f32.mrb[41].mxu1  ;;  %v2040_v59 = vpop.f32.mrb[41].mxu0  ;;  %v2365_v53 = vld [vmem:[#allocation2 + $0x10] sm:$0xff] }
 0x2ca   : > { %v2321_v38 = vadd.f32 %v3574_v12, %v2291_v10  ;;  %v2294_v34 = vld [vmem:[#allocation2 + $0xb8] sm:$0xff]  ;;  %2265 = vst.msk [vmem:[#allocation2 + $0xc0] sm:$0xff] %vm1614_vm4, %v2040_v59  ;;  %v3583_v61 = vpop.f32.mrb[42].mxu1  ;;  %v3617_v57 = vpop.f32.mrb[42].mxu0  ;;  %v2371_v10 = vld [vmem:[#allocation2 + $0x40] sm:$0xff] }
 0x2cb   : > { %2353 = vst.msk [vmem:[#allocation2 + $0xb0] sm:$0xff] %vm1614_vm4, %v2323_v7  ;;  %v2324_v58 = vadd.f32 %v2294_v34, %v1857_v50  ;;  %v2292_v56 = vld [vmem:[#allocation2 + $0xa8] sm:$0xff]  ;;  %2268 = vst.msk [vmem:[#allocation2 + $0xd8] sm:$0xff] %vm1614_vm4, %v3617_v57  ;;  %v1873_v3 = vpop.f32.mrb[43].mxu1  ;;  %v2043_v15 = vpop.f32.mrb[43].mxu0 }
 0x2cc   : > { %2351 = vst.msk [vmem:[#allocation2 + $0xa0] sm:$0xff] %vm1614_vm4, %v2321_v38  ;;  %v2322_v16 = vadd.f32 %v3575_v8, %v2292_v56  ;;  %2266 = vst.msk [vmem:[#allocation2 + $0xc8] sm:$0xff] %vm1614_vm4, %v2043_v15  ;;  %v2369_v38 = vld [vmem:[#allocation2 + $0x30] sm:$0xff] }
 0x2cd   : > { %2354 = vst.msk [vmem:[#allocation2 + $0xb8] sm:$0xff] %vm1614_vm4, %v2324_v58  ;;  %v2372_v58 = vld [vmem:[#allocation2 + $0x48] sm:$0xff] }
 0x2ce   : > { %2352 = vst.msk [vmem:[#allocation2 + $0xa8] sm:$0xff] %vm1614_vm4, %v2322_v16  ;;  %v2370_v16 = vld [vmem:[#allocation2 + $0x38] sm:$0xff] }
 0x2d0   : > { %v2297_v23 = vld [vmem:[#allocation2 + $0xd0] sm:$0xff]  ;;  %v3586_v29 = vpop.f32.mrb[44].mxu1  ;;  %v3620_v45 = vpop.f32.mrb[44].mxu0 }
 0x2d1   : > { %v2327_v49 = vadd.f32 %v2297_v23, %v1870_v13  ;;  %v2295_v62 = vld [vmem:[#allocation2 + $0xc0] sm:$0xff]  ;;  %2271 = vst.msk [vmem:[#allocation2 + $0xf0] sm:$0xff] %vm1614_vm4, %v3620_v45  ;;  %v1886_v46 = vpop.f32.mrb[45].mxu1  ;;  %v2056_v4 = vpop.f32.mrb[45].mxu0 }
 0x2d2   : > { %v2325_v48 = vadd.f32 %v3578_v28, %v2295_v62  ;;  %v2298_v36 = vld [vmem:[#allocation2 + $0xd8] sm:$0xff]  ;;  %2269 = vst.msk [vmem:[#allocation2 + $0xe0] sm:$0xff] %vm1614_vm4, %v2056_v4  ;;  %v3587_v39 = vpop.f32.mrb[46].mxu1  ;;  %v3621_v5 = vpop.f32.mrb[46].mxu0  ;;  %v2367_v28 = vld [vmem:[#allocation2 + $0x20] sm:$0xff] }
 0x2d3   : > { %2357 = vst.msk [vmem:[#allocation2 + $0xd0] sm:$0xff] %vm1614_vm4, %v2327_v49  ;;  %v2328_v41 = vadd.f32 %v2298_v36, %v1873_v3  ;;  %v2296_v31 = vld [vmem:[#allocation2 + $0xc8] sm:$0xff]  ;;  %2272 = vst.msk [vmem:[#allocation2 + $0xf8] sm:$0xff] %vm1614_vm4, %v3621_v5  ;;  %v1889_v26 = vpop.f32.mrb[47].mxu1  ;;  %v2059_v0 = vpop.f32.mrb[47].mxu0  ;;  %v2375_v5 = vld [vmem:[#allocation2 + $0x60] sm:$0xff] }
 0x2d4   : > { %2355 = vst.msk [vmem:[#allocation2 + $0xc0] sm:$0xff] %vm1614_vm4, %v2325_v48  ;;  %v2326_v51 = vadd.f32 %v3579_v43, %v2296_v31  ;;  %2270 = vst.msk [vmem:[#allocation2 + $0xe8] sm:$0xff] %vm1614_vm4, %v2059_v0 }
 0x2d5   : > { %2358 = vst.msk [vmem:[#allocation2 + $0xd8] sm:$0xff] %vm1614_vm4, %v2328_v41 }
 0x2d6   : > { %2356 = vst.msk [vmem:[#allocation2 + $0xc8] sm:$0xff] %vm1614_vm4, %v2326_v51  ;;  %v2373_v51 = vld [vmem:[#allocation2 + $0x50] sm:$0xff] }
 0x2d8   : > { %v2301_v30 = vld [vmem:[#allocation2 + $0xf0] sm:$0xff]  ;;  %v3626_v12 = vpop.f32.mrb[48].mxu1 }
 0x2d9   : > { %v2331_v20 = vadd.f32 %v2301_v30, %v1886_v46  ;;  %v2299_v54 = vld [vmem:[#allocation2 + $0xe0] sm:$0xff]  ;;  %v2393_v1 = vadd.f32 %v3626_v12, %v2363_v60  ;;  %v2116_v9 = vpop.f32.mrb[49].mxu1 }
 0x2da   : > { %v2329_v52 = vadd.f32 %v3582_v33, %v2299_v54  ;;  %v2302_v47 = vld [vmem:[#allocation2 + $0xf8] sm:$0xff]  ;;  %v3627_v8 = vpop.f32.mrb[50].mxu1 }
 0x2db   : > { %2361 = vst.msk [vmem:[#allocation2 + $0xf0] sm:$0xff] %vm1614_vm4, %v2331_v20  ;;  %v2332_v42 = vadd.f32 %v2302_v47, %v1889_v26  ;;  %v2300_v22 = vld [vmem:[#allocation2 + $0xe8] sm:$0xff]  ;;  %2423 = vst.msk [vmem:[#allocation2] sm:$0xff] %vm1614_vm4, %v2393_v1  ;;  %v2394_v63 = vadd.f32 %v3627_v8, %v2364_v44  ;;  %v2118_v25 = vpop.f32.mrb[51].mxu1  ;;  %v2374_v47 = vld [vmem:[#allocation2 + $0x58] sm:$0xff] }
 0x2dc   : > { %2359 = vst.msk [vmem:[#allocation2 + $0xe0] sm:$0xff] %vm1614_vm4, %v2329_v52  ;;  %v2330_v24 = vadd.f32 %v3583_v61, %v2300_v22  ;;  %v2376_v20 = vld [vmem:[#allocation2 + $0x68] sm:$0xff] }
 0x2dd   : > { %2362 = vst.msk [vmem:[#allocation2 + $0xf8] sm:$0xff] %vm1614_vm4, %v2332_v42  ;;  %2424 = vst.msk [vmem:[#allocation2 + $0x8] sm:$0xff] %vm1614_vm4, %v2394_v63 }
 0x2de   : > { %2360 = vst.msk [vmem:[#allocation2 + $0xe8] sm:$0xff] %vm1614_vm4, %v2330_v24 }
 0x2e0   : > { %v3630_v19 = vpop.f32.mrb[52].mxu1 }
 0x2e1   : > { %v2397_v18 = vadd.f32 %v3630_v19, %v2367_v28  ;;  %v2130_v21 = vpop.f32.mrb[53].mxu1 }
 0x2e2   : > { %v2395_v32 = vadd.f32 %v2365_v53, %v2130_v21  ;;  %v3631_v40 = vpop.f32.mrb[54].mxu1  ;;  %v2453_v43 = vld [vmem:[#allocation2] sm:$0xff] }
 0x2e3   : > { %2427 = vst.msk [vmem:[#allocation2 + $0x20] sm:$0xff] %vm1614_vm4, %v2397_v18  ;;  %v2398_v27 = vadd.f32 %v3631_v40, %v2368_v17  ;;  %v2133_v37 = vpop.f32.mrb[55].mxu1  ;;  %v2492_v50 = vadd.f32 %v5341_v55, %v2453_v43  ;;  %v2379_v53 = vld [vmem:[#allocation2 + $0x80] sm:$0xff] }
 0x2e4   : > { %2425 = vst.msk [vmem:[#allocation2 + $0x10] sm:$0xff] %vm1614_vm4, %v2395_v32  ;;  %v2396_v2 = vadd.f32 %v2366_v35, %v2133_v37  ;;  %v2454_v11 = vld [vmem:[#allocation2 + $0x8] sm:$0xff] }
 0x2e5   : > { %2428 = vst.msk [vmem:[#allocation2 + $0x28] sm:$0xff] %vm1614_vm4, %v2398_v27  ;;  %v2493_v14 = vadd.f32 %v5341_v55, %v2454_v11  ;;  %v2524_v33 = vmax.f32 %v2492_v50, 0.0  ;;  %v2377_v27 = vld [vmem:[#allocation2 + $0x70] sm:$0xff] }
 0x2e6   : > { %2426 = vst.msk [vmem:[#allocation2 + $0x18] sm:$0xff] %vm1614_vm4, %v2396_v2  ;;  %v2380_v2 = vld [vmem:[#allocation2 + $0x88] sm:$0xff] }
 0x2e7   : > { %v2525_v6 = vmax.f32 %v2493_v14, 0.0 }
 0x2e8   : > { %v3634_v7 = vpop.f32.mrb[56].mxu1 }
 0x2e9   : > { %v2401_v13 = vadd.f32 %v3634_v7, %v2371_v10  ;;  %v2146_v59 = vpop.f32.mrb[57].mxu1  ;;  %v2556_v34 = vpack.c.bf16 %v2525_v6, %v2524_v33  ;;  %v2378_v7 = vld [vmem:[#allocation2 + $0x78] sm:$0xff] }
 0x2ea   : > { %v2399_v61 = vadd.f32 %v2369_v38, %v2146_v59  ;;  %v3635_v57 = vpop.f32.mrb[58].mxu1  ;;  %v2457_v56 = vld [vmem:[#allocation2 + $0x20] sm:$0xff] }
 0x2eb   : > { %2431 = vst.msk [vmem:[#allocation2 + $0x40] sm:$0xff] %vm1614_vm4, %v2401_v13  ;;  %v2402_v3 = vadd.f32 %v3635_v57, %v2372_v58  ;;  %v2149_v15 = vpop.f32.mrb[59].mxu1  ;;  %3658 = vmatprep.mubr.msk.bf16.mxu0 %vm1614_vm4, %v2556_v34  ;;  %v2455_v23 = vld [vmem:[#allocation2 + $0x10] sm:$0xff]  ;;  %v2496_v46 = vadd.f32 %v5341_v55, %v2457_v56 }
 0x2ec   : > { %2429 = vst.msk [vmem:[#allocation2 + $0x30] sm:$0xff] %vm1614_vm4, %v2399_v61  ;;  %v2400_v29 = vadd.f32 %v2370_v16, %v2149_v15  ;;  %v2494_v45 = vadd.f32 %v5341_v55, %v2455_v23  ;;  %v2458_v49 = vld [vmem:[#allocation2 + $0x28] sm:$0xff]  ;;  %v2383_v16 = vld [vmem:[#allocation2 + $0xa0] sm:$0xff] }
 0x2ed   : > { %2432 = vst.msk [vmem:[#allocation2 + $0x48] sm:$0xff] %vm1614_vm4, %v2402_v3  ;;  %v2456_v62 = vld [vmem:[#allocation2 + $0x18] sm:$0xff]  ;;  %v2497_v4 = vadd.f32 %v5341_v55, %v2458_v49  ;;  %v2528_v30 = vmax.f32 %v2496_v46, 0.0 }
 0x2ee   : > { %2430 = vst.msk [vmem:[#allocation2 + $0x38] sm:$0xff] %vm1614_vm4, %v2400_v29  ;;  %v2495_v48 = vadd.f32 %v5341_v55, %v2456_v62  ;;  %v2526_v41 = vmax.f32 %v2494_v45, 0.0  ;;  %v2381_v62 = vld [vmem:[#allocation2 + $0x90] sm:$0xff] }
 0x2ef   : > { %v2529_v36 = vmax.f32 %v2497_v4, 0.0 }
 0x2f0   : > { %v3638_v39 = vpop.f32.mrb[60].mxu1  ;;  %v2527_v31 = vmax.f32 %v2495_v48, 0.0 }
 0x2f1   : > { %v2405_v26 = vadd.f32 %v3638_v39, %v2375_v5  ;;  %v2162_v0 = vpop.f32.mrb[61].mxu1  ;;  %v2558_v8 = vpack.c.bf16 %v2529_v36, %v2528_v30  ;;  %v2384_v36 = vld [vmem:[#allocation2 + $0xa8] sm:$0xff] }
 0x2f2   : > { %v2403_v12 = vadd.f32 %v2373_v51, %v2162_v0  ;;  %v3639_v60 = vpop.f32.mrb[62].mxu1  ;;  %v2557_v54 = vpack.c.bf16 %v2527_v31, %v2526_v41  ;;  %v2461_v1 = vld [vmem:[#allocation2 + $0x40] sm:$0xff] }
 0x2f3   : > { %2435 = vst.msk [vmem:[#allocation2 + $0x60] sm:$0xff] %vm1614_vm4, %v2405_v26  ;;  %v2406_v9 = vadd.f32 %v3639_v60, %v2376_v20  ;;  %v2165_v52 = vpop.f32.mrb[63].mxu1  ;;  %v2459_v44 = vld [vmem:[#allocation2 + $0x30] sm:$0xff]  ;;  %v2500_v24 = vadd.f32 %v5341_v55, %v2461_v1  ;;  %v2382_v26 = vld [vmem:[#allocation2 + $0x98] sm:$0xff] }
 0x2f4   : > { %2433 = vst.msk [vmem:[#allocation2 + $0x50] sm:$0xff] %vm1614_vm4, %v2403_v12  ;;  %v2404_v42 = vadd.f32 %v2374_v47, %v2165_v52  ;;  %3659 = vmatmul.mubr.msk.bf16.vlgmr.msra.gmra.mrb[48].mxu0 %vm1614_vm4, %v2557_v54  ;;  %v2498_v22 = vadd.f32 %v5341_v55, %v2459_v44  ;;  %v2462_v63 = vld [vmem:[#allocation2 + $0x48] sm:$0xff] }
 0x2f5   : > { %2436 = vst.msk [vmem:[#allocation2 + $0x68] sm:$0xff] %vm1614_vm4, %v2406_v9  ;;  %3662 = vmatprep.mubr.msk.bf16.mxu0 %vm1614_vm4, %v2558_v8  ;;  %v2460_v25 = vld [vmem:[#allocation2 + $0x38] sm:$0xff]  ;;  %v2501_v19 = vadd.f32 %v5341_v55, %v2462_v63  ;;  %v2532_v37 = vmax.f32 %v2500_v24, 0.0  ;;  %v2387_v8 = vld [vmem:[#allocation2 + $0xc0] sm:$0xff] }
 0x2f6   : > { %2434 = vst.msk [vmem:[#allocation2 + $0x58] sm:$0xff] %vm1614_vm4, %v2404_v42  ;;  %v2499_v28 = vadd.f32 %v5341_v55, %v2460_v25  ;;  %v2530_v32 = vmax.f32 %v2498_v22, 0.0  ;;  %v2385_v25 = vld [vmem:[#allocation2 + $0xb0] sm:$0xff] }
 0x2f7   : > { %v2533_v18 = vmax.f32 %v2501_v19, 0.0 }
 0x2f8   : > { %v3642_v21 = vpop.f32.mrb[64].mxu1  ;;  %v2531_v40 = vmax.f32 %v2499_v28, 0.0 }
 0x2f9   : > { %v2409_v17 = vadd.f32 %v3642_v21, %v2379_v53  ;;  %v2178_v43 = vpop.f32.mrb[65].mxu1  ;;  %v2560_v10 = vpack.c.bf16 %v2533_v18, %v2532_v37  ;;  %v2388_v18 = vld [vmem:[#allocation2 + $0xc8] sm:$0xff] }
 0x2fa   : > { %v2407_v35 = vadd.f32 %v2377_v27, %v2178_v43  ;;  %v3643_v50 = vpop.f32.mrb[66].mxu1  ;;  %v2559_v11 = vpack.c.bf16 %v2531_v40, %v2530_v32  ;;  %v2465_v14 = vld [vmem:[#allocation2 + $0x60] sm:$0xff] }
 0x2fb   : > { %2439 = vst.msk [vmem:[#allocation2 + $0x80] sm:$0xff] %vm1614_vm4, %v2409_v17  ;;  %v2410_v33 = vadd.f32 %v3643_v50, %v2380_v2  ;;  %v2181_v6 = vpop.f32.mrb[67].mxu1  ;;  %v2463_v13 = vld [vmem:[#allocation2 + $0x50] sm:$0xff]  ;;  %v2504_v57 = vadd.f32 %v5341_v55, %v2465_v14  ;;  %v2386_v17 = vld [vmem:[#allocation2 + $0xb8] sm:$0xff] }
 0x2fc   : > { %2437 = vst.msk [vmem:[#allocation2 + $0x70] sm:$0xff] %vm1614_vm4, %v2407_v35  ;;  %v2408_v59 = vadd.f32 %v2378_v7, %v2181_v6  ;;  %3663 = vmatmul.mubr.msk.bf16.gmra.mrb[52].mxu0 %vm1614_vm4, %v2559_v11  ;;  %v2502_v38 = vadd.f32 %v5341_v55, %v2463_v13  ;;  %v2466_v34 = vld [vmem:[#allocation2 + $0x68] sm:$0xff] }
 0x2fd   : > { %2440 = vst.msk [vmem:[#allocation2 + $0x88] sm:$0xff] %vm1614_vm4, %v2410_v33  ;;  %3666 = vmatprep.mubr.msk.bf16.mxu0 %vm1614_vm4, %v2560_v10  ;;  %v2464_v61 = vld [vmem:[#allocation2 + $0x58] sm:$0xff]  ;;  %v2505_v58 = vadd.f32 %v5341_v55, %v2466_v34  ;;  %v2536_v46 = vmax.f32 %v2504_v57, 0.0  ;;  %v2391_v10 = vld [vmem:[#allocation2 + $0xe0] sm:$0xff] }
 0x2fe   : > { %2438 = vst.msk [vmem:[#allocation2 + $0x78] sm:$0xff] %vm1614_vm4, %v2408_v59  ;;  %v2503_v56 = vadd.f32 %v5341_v55, %v2464_v61  ;;  %v2534_v23 = vmax.f32 %v2502_v38, 0.0  ;;  %v2389_v61 = vld [vmem:[#allocation2 + $0xd0] sm:$0xff] }
 0x2ff   : > { %v2537_v3 = vmax.f32 %v2505_v58, 0.0 }
 0x300   : > { %v3646_v15 = vpop.f32.mrb[68].mxu1  ;;  %v2535_v29 = vmax.f32 %v2503_v56, 0.0 }
 0x301   : > { %v2413_v45 = vadd.f32 %v3646_v15, %v2383_v16  ;;  %v2194_v49 = vpop.f32.mrb[69].mxu1  ;;  %v2562_v0 = vpack.c.bf16 %v2537_v3, %v2536_v46  ;;  %v2392_v3 = vld [vmem:[#allocation2 + $0xe8] sm:$0xff] }
 0x302   : > { %v2411_v4 = vadd.f32 %v2381_v62, %v2194_v49  ;;  %v3647_v48 = vpop.f32.mrb[70].mxu1  ;;  %v2561_v39 = vpack.c.bf16 %v2535_v29, %v2534_v23  ;;  %v2469_v5 = vld [vmem:[#allocation2 + $0x80] sm:$0xff] }
 0x303   : > { %2443 = vst.msk [vmem:[#allocation2 + $0xa0] sm:$0xff] %vm1614_vm4, %v2413_v45  ;;  %v2414_v41 = vadd.f32 %v3647_v48, %v2384_v36  ;;  %v2197_v31 = vpop.f32.mrb[71].mxu1  ;;  %v2467_v51 = vld [vmem:[#allocation2 + $0x70] sm:$0xff]  ;;  %v2508_v54 = vadd.f32 %v5341_v55, %v2469_v5  ;;  %v2390_v45 = vld [vmem:[#allocation2 + $0xd8] sm:$0xff] }
 0x304   : > { %2441 = vst.msk [vmem:[#allocation2 + $0x90] sm:$0xff] %vm1614_vm4, %v2411_v4  ;;  %v2412_v30 = vadd.f32 %v2382_v26, %v2197_v31  ;;  %3667 = vmatmul.mubr.msk.bf16.gmra.mrb[56].mxu0 %vm1614_vm4, %v2561_v39  ;;  %v2506_v12 = vadd.f32 %v5341_v55, %v2467_v51  ;;  %v2470_v60 = vld [vmem:[#allocation2 + $0x88] sm:$0xff] }
 0x305   : > { %2444 = vst.msk [vmem:[#allocation2 + $0xa8] sm:$0xff] %vm1614_vm4, %v2414_v41  ;;  %3670 = vmatprep.mubr.msk.bf16.mxu0 %vm1614_vm4, %v2562_v0  ;;  %v2468_v20 = vld [vmem:[#allocation2 + $0x78] sm:$0xff]  ;;  %v2509_v1 = vadd.f32 %v5341_v55, %v2470_v60  ;;  %v2540_v24 = vmax.f32 %v2508_v54, 0.0 }
 0x306   : > { %2442 = vst.msk [vmem:[#allocation2 + $0x98] sm:$0xff] %vm1614_vm4, %v2412_v30  ;;  %v2507_v9 = vadd.f32 %v5341_v55, %v2468_v20  ;;  %v2538_v44 = vmax.f32 %v2506_v12, 0.0 }
 0x307   : > { %v2541_v52 = vmax.f32 %v2509_v1, 0.0 }
 0x308   : > { %v3650_v47 = vpop.f32.mrb[72].mxu1  ;;  %v2539_v42 = vmax.f32 %v2507_v9, 0.0 }
 0x309   : > { %v2417_v22 = vadd.f32 %v3650_v47, %v2387_v8  ;;  %v2210_v63 = vpop.f32.mrb[73].mxu1  ;;  %v2564_v43 = vpack.c.bf16 %v2541_v52, %v2540_v24  ;;  %v2483_v24 = vld [vmem:[#allocation2 + $0xf0] sm:$0xff] }
 0x30a   : > { %v2415_v19 = vadd.f32 %v2385_v25, %v2210_v63  ;;  %v3651_v28 = vpop.f32.mrb[74].mxu1  ;;  %v2563_v21 = vpack.c.bf16 %v2539_v42, %v2538_v44  ;;  %v2473_v53 = vld [vmem:[#allocation2 + $0xa0] sm:$0xff]  ;;  %v2484_v42 = vld [vmem:[#allocation2 + $0xf8] sm:$0xff] }
 0x30b   : > { %2447 = vst.msk [vmem:[#allocation2 + $0xc0] sm:$0xff] %vm1614_vm4, %v2417_v22  ;;  %v2418_v32 = vadd.f32 %v3651_v28, %v2388_v18  ;;  %v2213_v40 = vpop.f32.mrb[75].mxu1  ;;  %v2471_v27 = vld [vmem:[#allocation2 + $0x90] sm:$0xff]  ;;  %v2512_v11 = vadd.f32 %v5341_v55, %v2473_v53  ;;  %v2523_v28 = vadd.f32 %v5341_v55, %v2484_v42 }
 0x30c   : > { %2445 = vst.msk [vmem:[#allocation2 + $0xb0] sm:$0xff] %vm1614_vm4, %v2415_v19  ;;  %v2416_v37 = vadd.f32 %v2386_v17, %v2213_v40  ;;  %3671 = vmatmul.mubr.msk.bf16.gmra.mrb[60].mxu0 %vm1614_vm4, %v2563_v21  ;;  %v2510_v35 = vadd.f32 %v5341_v55, %v2471_v27  ;;  %v2474_v50 = vld [vmem:[#allocation2 + $0xa8] sm:$0xff]  ;;  %v2522_v21 = vadd.f32 %v5341_v55, %v2483_v24  ;;  %v5424_v27 = vld [vmem:[%s5598_s6] ss:$0 sm:$0xff] }
 0x30d   : > { %2448 = vst.msk [vmem:[#allocation2 + $0xc8] sm:$0xff] %vm1614_vm4, %v2418_v32  ;;  %3674 = vmatprep.mubr.msk.bf16.mxu0 %vm1614_vm4, %v2564_v43  ;;  %v2472_v2 = vld [vmem:[#allocation2 + $0x98] sm:$0xff]  ;;  %v2513_v14 = vadd.f32 %v5341_v55, %v2474_v50  ;;  %v2544_v57 = vmax.f32 %v2512_v11, 0.0  ;;  %v2555_v53 = vmax.f32 %v2523_v28, 0.0  ;;  %v3420_v17 = vld [vmem:[%s4022_s15 + $0x8] sm:$0xff]   ;;  %v3357_v43 = vld [vmem:[%s4022_s15] sm:$0xff]  }
 0x30e   : > { %2446 = vst.msk [vmem:[#allocation2 + $0xb8] sm:$0xff] %vm1614_vm4, %v2416_v37  ;;  %v2511_v33 = vadd.f32 %v5341_v55, %v2472_v2  ;;  %v2542_v13 = vmax.f32 %v2510_v35, 0.0  ;;  %v2554_v32 = vmax.f32 %v2522_v21, 0.0  ;;  %v3362_v37 = vunpack.c.l.bf16 %v3420_v17 }
 0x30f   : > { %v2545_v6 = vmax.f32 %v2513_v14, 0.0  ;;  %v3358_v50 = vunpack.c.l.bf16 %v3357_v43  ;;  %v3363_v11 = vunpack.c.h.bf16 %v3420_v17 }
 0x310   : > { %v3654_v7 = vpop.f32.mrb[76].mxu1  ;;  %v2543_v59 = vmax.f32 %v2511_v33, 0.0  ;;  %v2571_v40 = vpack.c.bf16 %v2555_v53, %v2554_v32 }
 0x311   : > { %v2421_v38 = vadd.f32 %v3654_v7, %v2391_v10  ;;  %v2226_v34 = vpop.f32.mrb[77].mxu1  ;;  %v2566_v49 = vpack.c.bf16 %v2545_v6, %v2544_v57  ;;  %v3359_v6 = vunpack.c.h.bf16 %v3357_v43 }
 0x312   : > { %v2419_v58 = vadd.f32 %v2389_v61, %v2226_v34  ;;  %v3655_v56 = vpop.f32.mrb[78].mxu1  ;;  %v2565_v15 = vpack.c.bf16 %v2543_v59, %v2542_v13  ;;  %v2477_v16 = vld [vmem:[#allocation2 + $0xc0] sm:$0xff]  ;;  %v3422_v34 = vld [vmem:[%s4022_s15 + $0x18] sm:$0xff]  }
 0x313   : > { %2451 = vst.msk [vmem:[#allocation2 + $0xe0] sm:$0xff] %vm1614_vm4, %v2421_v38  ;;  %v2422_v23 = vadd.f32 %v3655_v56, %v2392_v3  ;;  %v2229_v29 = vpop.f32.mrb[79].mxu1  ;;  %v2475_v62 = vld [vmem:[#allocation2 + $0xb0] sm:$0xff]  ;;  %v2516_v39 = vadd.f32 %v5341_v55, %v2477_v16 }
 0x314   : > { %2449 = vst.msk [vmem:[#allocation2 + $0xd0] sm:$0xff] %vm1614_vm4, %v2419_v58  ;;  %v2420_v46 = vadd.f32 %v2390_v45, %v2229_v29  ;;  %3675 = vmatmul.mubr.msk.bf16.gmra.mrb[64].mxu0 %vm1614_vm4, %v2565_v15  ;;  %v2514_v4 = vadd.f32 %v5341_v55, %v2475_v62  ;;  %v2478_v48 = vld [vmem:[#allocation2 + $0xc8] sm:$0xff]  ;;  %v3421_v58 = vld [vmem:[%s4022_s15 + $0x10] sm:$0xff]  }
 0x315   : > { %2452 = vst.msk [vmem:[#allocation2 + $0xe8] sm:$0xff] %vm1614_vm4, %v2422_v23  ;;  %3678 = vmatprep.mubr.msk.bf16.mxu0 %vm1614_vm4, %v2566_v49  ;;  %v2476_v36 = vld [vmem:[#allocation2 + $0xb8] sm:$0xff]  ;;  %v2517_v5 = vadd.f32 %v5341_v55, %v2478_v48  ;;  %v2548_v51 = vmax.f32 %v2516_v39, 0.0  ;;  %v3370_v23 = vunpack.c.l.bf16 %v3422_v34  ;;  %v3366_v62 = vunpack.c.l.bf16 %v3421_v58 }
 0x316   : > { %2450 = vst.msk [vmem:[#allocation2 + $0xd8] sm:$0xff] %vm1614_vm4, %v2420_v46  ;;  %v2515_v41 = vadd.f32 %v5341_v55, %v2476_v36  ;;  %v2546_v26 = vmax.f32 %v2514_v4, 0.0  ;;  %v3371_v36 = vunpack.c.h.bf16 %v3422_v34 }
 0x317   : > { %v2549_v31 = vmax.f32 %v2517_v5, 0.0 }
 0x318   : > { %v2547_v0 = vmax.f32 %v2515_v41, 0.0 }
 0x319   : > { %v2568_v60 = vpack.c.bf16 %v2549_v31, %v2548_v51  ;;  %v3367_v31 = vunpack.c.h.bf16 %v3421_v58 }
 0x31a   : > { %v2567_v30 = vpack.c.bf16 %v2547_v0, %v2546_v26  ;;  %v2481_v12 = vld [vmem:[#allocation2 + $0xe0] sm:$0xff] }
 0x31b   : > { %v2479_v20 = vld [vmem:[#allocation2 + $0xd0] sm:$0xff]  ;;  %v2520_v52 = vadd.f32 %v5341_v55, %v2481_v12 }
 0x31c   : > { %3679 = vmatmul.mubr.msk.bf16.gmra.mrb[68].mxu0 %vm1614_vm4, %v2567_v30  ;;  %v2518_v54 = vadd.f32 %v5341_v55, %v2479_v20  ;;  %v2482_v1 = vld [vmem:[#allocation2 + $0xe8] sm:$0xff] }
 0x31d   : > { %3682 = vmatprep.mubr.msk.bf16.mxu0 %vm1614_vm4, %v2568_v60  ;;  %v2480_v9 = vld [vmem:[#allocation2 + $0xd8] sm:$0xff]  ;;  %v2521_v47 = vadd.f32 %v5341_v55, %v2482_v1  ;;  %v2552_v25 = vmax.f32 %v2520_v52, 0.0  ;;  %v3424_v60 = vld [vmem:[%s4022_s15 + $0x28] sm:$0xff]   ;;  %v3423_v1 = vld [vmem:[%s4022_s15 + $0x20] sm:$0xff]  }
 0x31e   : > { %v2519_v8 = vadd.f32 %v5341_v55, %v2480_v9  ;;  %v2550_v22 = vmax.f32 %v2518_v54, 0.0 }
 0x31f   : > { %v2553_v44 = vmax.f32 %v2521_v47, 0.0 }
 0x320   : > { %v2551_v63 = vmax.f32 %v2519_v8, 0.0 }
 0x321   : > { %v2570_v18 = vpack.c.bf16 %v2553_v44, %v2552_v25  ;;  %v3378_v44 = vunpack.c.l.bf16 %v3424_v60  ;;  %v3374_v25 = vunpack.c.l.bf16 %v3423_v1 }
 0x322   : > { %v2569_v19 = vpack.c.bf16 %v2551_v63, %v2550_v22 }
 0x324   : > { %3683 = vmatmul.mubr.msk.bf16.gmra.mrb[72].mxu0 %vm1614_vm4, %v2569_v19 }
 0x325   : > { %3686 = vmatprep.mubr.msk.bf16.mxu0 %vm1614_vm4, %v2570_v18  ;;  %v3379_v18 = vunpack.c.h.bf16 %v3424_v60 }
 0x32c   : > { %3687 = vmatmul.mubr.msk.bf16.gmra.mrb[76].mxu0 %vm1614_vm4, %v2571_v40  ;;  %v3375_v40 = vunpack.c.h.bf16 %v3423_v1 }
 0x3c7   : > { %v3660_v35 = vpop.f32.mrb[48].mxu0 }
 0x3c8   : > { %v2675_v55 = vadd.f32 %v3660_v35, %v5424_v27  ;;  %v2666_v2 = vpop.f32.mrb[49].mxu0 }
 0x3c9   : > { %v2667_v14 = vadd.f32 %v5424_v27, %v2666_v2  ;;  %v3661_v33 = vpop.f32.mrb[50].mxu0 }
 0x3ca   : > { %v2859_v7 = vadd.f32 %v3362_v37, %v2675_v55  ;;  %v2678_v10 = vadd.f32 %v3661_v33, %v5424_v27  ;;  %v2669_v13 = vpop.f32.mrb[51].mxu0  ;;  %v3426_v55 = vld [vmem:[%s4022_s15 + $0x38] sm:$0xff]  }
 0x3cb   : > { %v2857_v59 = vadd.f32 %v3358_v50, %v2667_v14  ;;  %v2670_v38 = vadd.f32 %v5424_v27, %v2669_v13  ;;  %v3425_v14 = vld [vmem:[%s4022_s15 + $0x30] sm:$0xff]   ;;  %v3386_v13 = vunpack.c.l.bf16 %v3426_v55 }
 0x3cc   : > { %v2891_v61 = vmax.f32 %v2859_v7, 0.0  ;;  %v2860_v57 = vadd.f32 %v3363_v11, %v2678_v10 }
 0x3cd   : > { %v2889_v56 = vmax.f32 %v2857_v59, 0.0  ;;  %v2858_v3 = vadd.f32 %v3359_v6, %v2670_v38 }
 0x3ce   : > { %v3325_v15 = vpack.c.bf16 %v2891_v61, %v2891_v61  ;;  %v2892_v16 = vmax.f32 %v2860_v57, 0.0  ;;  %v3382_v61 = vunpack.c.l.bf16 %v3425_v14 }
 0x3cf   : > { %v3323_v29 = vpack.c.bf16 %v2889_v56, %v2889_v56  ;;  %v2890_v45 = vmax.f32 %v2858_v3, 0.0  ;;  %v3664_v49 = vpop.f32.mrb[52].mxu0  ;;  %v3387_v3 = vunpack.c.h.bf16 %v3426_v55 }
 0x3d0   : > { %3052 = vst.msk [vmem:[%s5434_s9 + $0x8] sm:$0xf] %vm3049_vm10, %v3325_v15  ;;  %v3326_v46 = vpack.c.bf16 %v2892_v16, %v2892_v16  ;;  %v2691_v4 = vadd.f32 %v3664_v49, %v5424_v27  ;;  %v2682_v48 = vpop.f32.mrb[53].mxu0 }
 0x3d1   : > { %3050 = vst.msk [vmem:[%s5434_s9] sm:$0xf] %vm3049_vm10, %v3323_v29  ;;  %v3324_v39 = vpack.c.bf16 %v2890_v45, %v2890_v45  ;;  %v2683_v5 = vadd.f32 %v5424_v27, %v2682_v48  ;;  %v3665_v41 = vpop.f32.mrb[54].mxu0  ;;  %v3383_v29 = vunpack.c.h.bf16 %v3425_v14  ;;  %v3428_v48 = vld [vmem:[%s4022_s15 + $0x48] sm:$0xff]  }
 0x3d2   : > { %3053 = vst.msk [vmem:[%s5434_s9 + $0xc] sm:$0xf] %vm3049_vm10, %v3326_v46  ;;  %v2863_v26 = vadd.f32 %v3370_v23, %v2691_v4  ;;  %v2694_v0 = vadd.f32 %v3665_v41, %v5424_v27  ;;  %v2685_v51 = vpop.f32.mrb[55].mxu0 }
 0x3d3   : > { %3051 = vst.msk [vmem:[%s5434_s9 + $0x4] sm:$0xf] %vm3049_vm10, %v3324_v39  ;;  %v2861_v30 = vadd.f32 %v3366_v62, %v2683_v5  ;;  %v2686_v12 = vadd.f32 %v5424_v27, %v2685_v51  ;;  %v3427_v5 = vld [vmem:[%s4022_s15 + $0x40] sm:$0xff]   ;;  %v3394_v51 = vunpack.c.l.bf16 %v3428_v48 }
 0x3d4   : > { %v2895_v20 = vmax.f32 %v2863_v26, 0.0  ;;  %v2864_v54 = vadd.f32 %v3371_v36, %v2694_v0 }
 0x3d5   : > { %v2893_v9 = vmax.f32 %v2861_v30, 0.0  ;;  %v2862_v52 = vadd.f32 %v3367_v31, %v2686_v12 }
 0x3d6   : > { %v3329_v47 = vpack.c.bf16 %v2895_v20, %v2895_v20  ;;  %v2896_v8 = vmax.f32 %v2864_v54, 0.0  ;;  %v3390_v20 = vunpack.c.l.bf16 %v3427_v5 }
 0x3d7   : > { %v3327_v42 = vpack.c.bf16 %v2893_v9, %v2893_v9  ;;  %v2894_v22 = vmax.f32 %v2862_v52, 0.0  ;;  %v3668_v63 = vpop.f32.mrb[56].mxu0  ;;  %v3395_v52 = vunpack.c.h.bf16 %v3428_v48 }
 0x3d8   : > { %3056 = vst.msk [vmem:[%s5434_s9 + $0x18] sm:$0xf] %vm3049_vm10, %v3329_v47  ;;  %v3330_v24 = vpack.c.bf16 %v2896_v8, %v2896_v8  ;;  %v2707_v19 = vadd.f32 %v3668_v63, %v5424_v27  ;;  %v2698_v28 = vpop.f32.mrb[57].mxu0 }
 0x3d9   : > { %3054 = vst.msk [vmem:[%s5434_s9 + $0x10] sm:$0xf] %vm3049_vm10, %v3327_v42  ;;  %v3328_v21 = vpack.c.bf16 %v2894_v22, %v2894_v22  ;;  %v2699_v53 = vadd.f32 %v5424_v27, %v2698_v28  ;;  %v3669_v32 = vpop.f32.mrb[58].mxu0  ;;  %v3391_v42 = vunpack.c.h.bf16 %v3427_v5  ;;  %v3430_v28 = vld [vmem:[%s4022_s15 + $0x58] sm:$0xff]  }
 0x3da   : > { %3057 = vst.msk [vmem:[%s5434_s9 + $0x1c] sm:$0xf] %vm3049_vm10, %v3330_v24  ;;  %v2867_v17 = vadd.f32 %v3378_v44, %v2707_v19  ;;  %v2710_v43 = vadd.f32 %v3669_v32, %v5424_v27  ;;  %v2701_v37 = vpop.f32.mrb[59].mxu0 }
 0x3db   : > { %3055 = vst.msk [vmem:[%s5434_s9 + $0x14] sm:$0xf] %vm3049_vm10, %v3328_v21  ;;  %v2865_v35 = vadd.f32 %v3374_v25, %v2699_v53  ;;  %v2702_v50 = vadd.f32 %v5424_v27, %v2701_v37  ;;  %v3429_v53 = vld [vmem:[%s4022_s15 + $0x50] sm:$0xff]   ;;  %v3402_v37 = vunpack.c.l.bf16 %v3430_v28 }
 0x3dc   : > { %v2899_v2 = vmax.f32 %v2867_v17, 0.0  ;;  %v2868_v11 = vadd.f32 %v3379_v18, %v2710_v43 }
 0x3dd   : > { %v2897_v33 = vmax.f32 %v2865_v35, 0.0  ;;  %v2866_v6 = vadd.f32 %v3375_v40, %v2702_v50 }
 0x3de   : > { %v3333_v7 = vpack.c.bf16 %v2899_v2, %v2899_v2  ;;  %v2900_v10 = vmax.f32 %v2868_v11, 0.0  ;;  %v3398_v2 = vunpack.c.l.bf16 %v3429_v53 }
 0x3df   : > { %v3331_v59 = vpack.c.bf16 %v2897_v33, %v2897_v33  ;;  %v2898_v38 = vmax.f32 %v2866_v6, 0.0  ;;  %v3672_v34 = vpop.f32.mrb[60].mxu0  ;;  %v3403_v6 = vunpack.c.h.bf16 %v3430_v28 }
 0x3e0   : > { %3060 = vst.msk [vmem:[%s5434_s9 + $0x28] sm:$0xf] %vm3049_vm10, %v3333_v7  ;;  %v3334_v57 = vpack.c.bf16 %v2900_v10, %v2900_v10  ;;  %v2723_v58 = vadd.f32 %v3672_v34, %v5424_v27  ;;  %v2714_v56 = vpop.f32.mrb[61].mxu0 }
 0x3e1   : > { %3058 = vst.msk [vmem:[%s5434_s9 + $0x20] sm:$0xf] %vm3049_vm10, %v3331_v59  ;;  %v3332_v15 = vpack.c.bf16 %v2898_v38, %v2898_v38  ;;  %v2715_v16 = vadd.f32 %v5424_v27, %v2714_v56  ;;  %v3673_v23 = vpop.f32.mrb[62].mxu0  ;;  %v3399_v59 = vunpack.c.h.bf16 %v3429_v53  ;;  %v3432_v56 = vld [vmem:[%s4022_s15 + $0x68] sm:$0xff]  }
 0x3e2   : > { %3061 = vst.msk [vmem:[%s5434_s9 + $0x2c] sm:$0xf] %vm3049_vm10, %v3334_v57  ;;  %v2871_v45 = vadd.f32 %v3386_v13, %v2723_v58  ;;  %v2726_v49 = vadd.f32 %v3673_v23, %v5424_v27  ;;  %v2717_v62 = vpop.f32.mrb[63].mxu0 }
 0x3e3   : > { %3059 = vst.msk [vmem:[%s5434_s9 + $0x24] sm:$0xf] %vm3049_vm10, %v3332_v15  ;;  %v2869_v46 = vadd.f32 %v3382_v61, %v2715_v16  ;;  %v2718_v4 = vadd.f32 %v5424_v27, %v2717_v62  ;;  %v3431_v16 = vld [vmem:[%s4022_s15 + $0x60] sm:$0xff]   ;;  %v3410_v62 = vunpack.c.l.bf16 %v3432_v56 }
 0x3e4   : > { %v2903_v36 = vmax.f32 %v2871_v45, 0.0  ;;  %v2872_v39 = vadd.f32 %v3387_v3, %v2726_v49 }
 0x3e5   : > { %v2901_v41 = vmax.f32 %v2869_v46, 0.0  ;;  %v2870_v31 = vadd.f32 %v3383_v29, %v2718_v4 }
 0x3e6   : > { %v3337_v26 = vpack.c.bf16 %v2903_v36, %v2903_v36  ;;  %v2904_v0 = vmax.f32 %v2872_v39, 0.0  ;;  %v3406_v36 = vunpack.c.l.bf16 %v3431_v16 }
 0x3e7   : > { %v3335_v30 = vpack.c.bf16 %v2901_v41, %v2901_v41  ;;  %v2902_v12 = vmax.f32 %v2870_v31, 0.0  ;;  %v3676_v60 = vpop.f32.mrb[64].mxu0  ;;  %v3411_v31 = vunpack.c.h.bf16 %v3432_v56 }
 0x3e8   : > { %3064 = vst.msk [vmem:[%s5434_s9 + $0x38] sm:$0xf] %vm3049_vm10, %v3337_v26  ;;  %v3338_v54 = vpack.c.bf16 %v2904_v0, %v2904_v0  ;;  %v2739_v1 = vadd.f32 %v3676_v60, %v5424_v27  ;;  %v2730_v9 = vpop.f32.mrb[65].mxu0 }
 0x3e9   : > { %3062 = vst.msk [vmem:[%s5434_s9 + $0x30] sm:$0xf] %vm3049_vm10, %v3335_v30  ;;  %v3336_v47 = vpack.c.bf16 %v2902_v12, %v2902_v12  ;;  %v2731_v8 = vadd.f32 %v5424_v27, %v2730_v9  ;;  %v3677_v44 = vpop.f32.mrb[66].mxu0  ;;  %v3407_v30 = vunpack.c.h.bf16 %v3431_v16  ;;  %v3434_v9 = vld [vmem:[%s4022_s15 + $0x78] sm:$0xff]  }
 0x3ea   : > { %3065 = vst.msk [vmem:[%s5434_s9 + $0x3c] sm:$0xf] %vm3049_vm10, %v3338_v54  ;;  %v2875_v22 = vadd.f32 %v3394_v51, %v2739_v1  ;;  %v2742_v63 = vadd.f32 %v3677_v44, %v5424_v27  ;;  %v2733_v25 = vpop.f32.mrb[67].mxu0 }
 0x3eb   : > { %3063 = vst.msk [vmem:[%s5434_s9 + $0x34] sm:$0xf] %vm3049_vm10, %v3336_v47  ;;  %v2873_v24 = vadd.f32 %v3390_v20, %v2731_v8  ;;  %v2734_v19 = vadd.f32 %v5424_v27, %v2733_v25  ;;  %v3433_v8 = vld [vmem:[%s4022_s15 + $0x70] sm:$0xff]   ;;  %v3418_v25 = vunpack.c.l.bf16 %v3434_v9  ;;  %s3096_s15 = sshll.u32 %s5434_s9, 4  ;;  %s5543_s15 = int_to_ptr.vmem [resolvable:$true] %s3096_s15 }
 0x3ec   : > { %v2907_v18 = vmax.f32 %v2875_v22, 0.0  ;;  %v2876_v21 = vadd.f32 %v3395_v52, %v2742_v63  ;;  %s3797_s22 = scalar_lea.vmem %s5543_s15, 2048  ;;  %p3804_p8 = scmp.lt.s32.totalorder %s5543_s15, %s3802_s23 }
 0x3ed   : > { %v2905_v32 = vmax.f32 %v2873_v24, 0.0  ;;  %v2874_v40 = vadd.f32 %v3391_v42, %v2734_v19  ;;  %p3798_p6 = scmp.ne.s32.totalorder %s5543_s15, %s3797_s22  ;;  %p3805_p10 = scmp.lt.s32.totalorder %s3803_s29, %s3797_s22 }
 0x3ee   : > { %v3341_v17 = vpack.c.bf16 %v2907_v18, %v2907_v18  ;;  %v2908_v43 = vmax.f32 %v2876_v21, 0.0  ;;  %v3414_v18 = vunpack.c.l.bf16 %v3433_v8 }
 0x3ef   : > { %v3339_v35 = vpack.c.bf16 %v2905_v32, %v2905_v32  ;;  %v2906_v50 = vmax.f32 %v2874_v40, 0.0  ;;  %v3680_v55 = vpop.f32.mrb[68].mxu0  ;;  %v3419_v40 = vunpack.c.h.bf16 %v3434_v9  ;;  %p3799_p12 = pnand %p3798_p6, %p5868_p11  ;;  %p3806_p0 = por %p3805_p10, %p3804_p8 }
 0x3f0   : > { %3068 = vst.msk [vmem:[%s5434_s9 + $0x48] sm:$0xf] %vm3049_vm10, %v3341_v17  ;;  %v3342_v11 = vpack.c.bf16 %v2908_v43, %v2908_v43  ;;  %v2755_v14 = vadd.f32 %v3680_v55, %v5424_v27  ;;  %v2746_v33 = vpop.f32.mrb[69].mxu0 }
 0x3f1   : > { %3066 = vst.msk [vmem:[%s5434_s9 + $0x40] sm:$0xf] %vm3049_vm10, %v3339_v35  ;;  %v3340_v7 = vpack.c.bf16 %v2906_v50, %v2906_v50  ;;  %v2747_v10 = vadd.f32 %v5424_v27, %v2746_v33  ;;  %v3681_v13 = vpop.f32.mrb[70].mxu0  ;;  %v3415_v35 = vunpack.c.h.bf16 %v3433_v8  ;;  %p3800_p13 = pneg %p3799_p12 }
 0x3f2   : > { %3069 = vst.msk [vmem:[%s5434_s9 + $0x4c] sm:$0xf] %vm3049_vm10, %v3342_v11  ;;  %v2879_v38 = vadd.f32 %v3402_v37, %v2755_v14  ;;  %v2758_v34 = vadd.f32 %v3681_v13, %v5424_v27  ;;  %v2749_v61 = vpop.f32.mrb[71].mxu0 }
 0x3f3   : > { %3067 = vst.msk [vmem:[%s5434_s9 + $0x44] sm:$0xf] %vm3049_vm10, %v3340_v7  ;;  %v2877_v57 = vadd.f32 %v3398_v2, %v2747_v10  ;;  %v2750_v58 = vadd.f32 %v5424_v27, %v2749_v61  ;;  %p3807_p2 = pnand %p3806_p0, %p3800_p13 }
 0x3f4   : > { %v2911_v3 = vmax.f32 %v2879_v38, 0.0  ;;  %v2880_v15 = vadd.f32 %v3403_v6, %v2758_v34 }
 0x3f5   : > { %v2909_v23 = vmax.f32 %v2877_v57, 0.0  ;;  %v2878_v29 = vadd.f32 %v3399_v59, %v2750_v58 }
 0x3f6   : > { %v3345_v45 = vpack.c.bf16 %v2911_v3, %v2911_v3  ;;  %v2912_v49 = vmax.f32 %v2880_v15, 0.0 }
 0x3f7   : > { %v3343_v46 = vpack.c.bf16 %v2909_v23, %v2909_v23  ;;  %v2910_v4 = vmax.f32 %v2878_v29, 0.0  ;;  %v3684_v48 = vpop.f32.mrb[72].mxu0 }
 0x3f8   : > { %3072 = vst.msk [vmem:[%s5434_s9 + $0x58] sm:$0xf] %vm3049_vm10, %v3345_v45  ;;  %v3346_v39 = vpack.c.bf16 %v2912_v49, %v2912_v49  ;;  %v2771_v5 = vadd.f32 %v3684_v48, %v5424_v27  ;;  %v2762_v41 = vpop.f32.mrb[73].mxu0 }
 0x3f9   : > { %3070 = vst.msk [vmem:[%s5434_s9 + $0x50] sm:$0xf] %vm3049_vm10, %v3343_v46  ;;  %v3344_v26 = vpack.c.bf16 %v2910_v4, %v2910_v4  ;;  %v2763_v0 = vadd.f32 %v5424_v27, %v2762_v41  ;;  %v3685_v51 = vpop.f32.mrb[74].mxu0 }
 0x3fa   : > { %3073 = vst.msk [vmem:[%s5434_s9 + $0x5c] sm:$0xf] %vm3049_vm10, %v3346_v39  ;;  %v2883_v12 = vadd.f32 %v3410_v62, %v2771_v5  ;;  %v2774_v60 = vadd.f32 %v3685_v51, %v5424_v27  ;;  %v2765_v20 = vpop.f32.mrb[75].mxu0 }
 0x3fb   : > { %3071 = vst.msk [vmem:[%s5434_s9 + $0x54] sm:$0xf] %vm3049_vm10, %v3344_v26  ;;  %v2881_v54 = vadd.f32 %v3406_v36, %v2763_v0  ;;  %v2766_v1 = vadd.f32 %v5424_v27, %v2765_v20 }
 0x3fc   : > { %v2915_v52 = vmax.f32 %v2883_v12, 0.0  ;;  %v2884_v47 = vadd.f32 %v3411_v31, %v2774_v60 }
 0x3fd   : > { %v2913_v44 = vmax.f32 %v2881_v54, 0.0  ;;  %v2882_v42 = vadd.f32 %v3407_v30, %v2766_v1 }
 0x3fe   : > { %v3349_v22 = vpack.c.bf16 %v2915_v52, %v2915_v52  ;;  %v2916_v63 = vmax.f32 %v2884_v47, 0.0 }
 0x3ff   : > { %v3347_v24 = vpack.c.bf16 %v2913_v44, %v2913_v44  ;;  %v2914_v19 = vmax.f32 %v2882_v42, 0.0  ;;  %v3688_v28 = vpop.f32.mrb[76].mxu0 }
 0x400   : > { %3076 = vst.msk [vmem:[%s5434_s9 + $0x68] sm:$0xf] %vm3049_vm10, %v3349_v22  ;;  %v3350_v21 = vpack.c.bf16 %v2916_v63, %v2916_v63  ;;  %v2787_v53 = vadd.f32 %v3688_v28, %v5424_v27  ;;  %v2778_v32 = vpop.f32.mrb[77].mxu0 }
 0x401   : > { %3074 = vst.msk [vmem:[%s5434_s9 + $0x60] sm:$0xf] %vm3049_vm10, %v3347_v24  ;;  %v3348_v17 = vpack.c.bf16 %v2914_v19, %v2914_v19  ;;  %v2779_v43 = vadd.f32 %v5424_v27, %v2778_v32  ;;  %v3689_v37 = vpop.f32.mrb[78].mxu0 }
 0x402   : > { %3077 = vst.msk [vmem:[%s5434_s9 + $0x6c] sm:$0xf] %vm3049_vm10, %v3350_v21  ;;  %v2887_v50 = vadd.f32 %v3418_v25, %v2787_v53  ;;  %v2790_v55 = vadd.f32 %v3689_v37, %v5424_v27  ;;  %v2781_v2 = vpop.f32.mrb[79].mxu0 }
 0x403   : > { %3075 = vst.msk [vmem:[%s5434_s9 + $0x64] sm:$0xf] %vm3049_vm10, %v3348_v17  ;;  %v2885_v11 = vadd.f32 %v3414_v18, %v2779_v43  ;;  %v2782_v14 = vadd.f32 %v5424_v27, %v2781_v2 }
 0x404   : > { %v2919_v33 = vmax.f32 %v2887_v50, 0.0  ;;  %v2888_v6 = vadd.f32 %v3419_v40, %v2790_v55 }
 0x405   : > { %v2917_v7 = vmax.f32 %v2885_v11, 0.0  ;;  %v2886_v10 = vadd.f32 %v3415_v35, %v2782_v14 }
 0x406   : > { %v3353_v13 = vpack.c.bf16 %v2919_v33, %v2919_v33  ;;  %v2920_v59 = vmax.f32 %v2888_v6, 0.0 }
 0x407   : > { %v3351_v38 = vpack.c.bf16 %v2917_v7, %v2917_v7  ;;  %v2918_v34 = vmax.f32 %v2886_v10, 0.0 }
 0x408   : > { %3080 = vst.msk [vmem:[%s5434_s9 + $0x78] sm:$0xf] %vm3049_vm10, %v3353_v13  ;;  %v3354_v61 = vpack.c.bf16 %v2920_v59, %v2920_v59 }
 0x409   : > { %3078 = vst.msk [vmem:[%s5434_s9 + $0x70] sm:$0xf] %vm3049_vm10, %v3351_v38  ;;  %v3352_v27 = vpack.c.bf16 %v2918_v34, %v2918_v34 }
 0x40a   : > { %3081 = vst.msk [vmem:[%s5434_s9 + $0x7c] sm:$0xf] %vm3049_vm10, %v3354_v61 }
 0x40b   : > { %3079 = vst.msk [vmem:[%s5434_s9 + $0x74] sm:$0xf] %vm3049_vm10, %v3352_v27 }
 0x40c   : > { %3810 = shalt.err (!%p3807_p2)
}
 0x40d   : > { %s3811_s19 = scalar_lea.hbm %s5539_s20, 2048  ;;  %s3815_s17 = scalar_lea.hbm %s5599_s7, 4096 }
 0x40e   : > { %p3812_p4 = scmp.ne.s32.totalorder %s5539_s20, %s3811_s19  ;;  %p3816_p9 = scmp.lt.u32.totalorder %s5539_s20, %s5599_s7 }
 0x40f   : > { %p3817_p1 = scmp.lt.u32.totalorder %s3815_s17, %s3811_s19  ;;  %p3819_p6 = scmp.lt.u32.totalorder %s3811_s19, %s5539_s20 }
 0x410   : > { %p3813_p5 = pnand %p3812_p4, %p5868_p11 }
 0x411   : > { %p3818_p3 = por %p3817_p1, %p3816_p9 }
 0x412   : > { %p3814_p7 = pneg %p3813_p5 }
 0x413   : > { %p3820_p12 = por %p3819_p6, %p3818_p3 }
 0x415   : > { %p3821_p13 = pnand %p3820_p12, %p3814_p7 }
 0x417   : > { %3824 = shalt.err (!%p3821_p13)
}
 0x418   : > { %s3871_s22 = smov 64  }
 0x419   : > { %3698 = dma.vmem_to_hbm [thread:$0]  (%p5868_p11), %s5543_s15, 2048, %s5539_s20, %s3083_s28, %s3871_s22, %s3871_s22, %s3868_s8  }
 0x41a PF: > { %s3111_s12 = sand.u32 1, %s3851_s24   ;;  %p5869_p8 = scmp.ne.s32.totalorder %s5628_s14, 0 }
 0x41b   : > { %p5870_p10 = scmp.ge.s32.totalorder %s3863_s27, 2  ;;  %s3112_s23 = scalar_lea.sflag [#allocation5], %s3111_s12 }
 0x41d   : > { %p3705_p0 = pnand %p5870_p10, %p5869_p8 }
 0x41f   : > { %3846 = dma.done.wait (!%p3705_p0), %s3112_s23, 2048  }
 0x420   : > { %3848 = vsyncadd (!%p3705_p0), %s3112_s23, 4294965248  ;;  %p20_p2 = scmp.ge.s32.totalorder %s3937_s30, 4   ;;  %s5871_s24 = smov %s3855_s25 }
 0x421   : > { %s5872_s25 = smov %s3859_s26  ;;  %s5873_s26 = smov %s3949_s10 }
 0x422   : > { %s5874_s27 = smov %s3937_s30  ;;  %22 = sbr.rel (!%p20_p2) target bundleno = 5 (0x5), region = 95 }
 0x429   :  { %3117 = vsyncpa [#allocation4], 1 }
 0x42a   :  { %3119 = vsyncpa [#allocation4 + $0x1], 1 }
 0x42b   :  { %3120 = vsyncpa [#allocation5], 1 }
 0x42c   :  { %3122 = vsyncpa [#allocation5 + $0x1], 1 }

</bundles_post_ra>
